<compile_context>
chip_gen: v7x
topology: tpu7x:2x2x1
jax: 0.10.0
libtpu: 0.0.40
codegen_flags: <defaults>
</compile_context>

<pallas_src>
import functools

import jax
import jax.numpy as jnp
from jax.experimental import pallas as pl
from jax.experimental.pallas import tpu as pltpu


def _residual_block_kernel(x_ref, wb1_ref, b1_ref, wb2_ref, b2_ref, o_ref, stk_ref,
                           *, img_rows):
    # x_ref   : (M, W*C)        M = NB*H packed rows of NB images (lane-dense)
    # wb*_ref : (3*W*C, W*C)    block-banded conv weights (see _pack_banded_weight)
    # b*_ref  : (1, W*C)        conv bias tiled across W
    # o_ref   : (M, W*C)
    # stk_ref : VMEM (M, 3*W*C) stacked 3-row-tap matmul operand
    M, WC = x_ref.shape
    H = img_rows

    x = x_ref[...].astype(jnp.float32)

    # Per-image row index of every packed row; rows on an image's top/bottom edge get
    # their out-of-image vertical tap zeroed (replaces halo-row zeroing and keeps the
    # kh shifts from bleeding across images inside a batched block).
    row_in_img = jax.lax.broadcasted_iota(jnp.int32, (M, WC), 0) % H
    top_edge = row_in_img == 0
    bot_edge = row_in_img == (H - 1)

    def conv3x3_relu(inp, wb_ref, b_ref):
        # Stage the three vertically shifted copies of the rows side by side along
        # lanes: stk[:, kh*WC:(kh+1)*WC] holds row (r + kh - 1), zero outside the
        # image.  Horizontal taps / width padding live in the banded weight.
        stk_ref[:, WC:2 * WC] = inp                                   # kh = 1: row r
        up = pltpu.roll(inp, shift=1, axis=0)                         # up[r] = inp[r-1]
        stk_ref[:, 0:WC] = jnp.where(top_edge, 0.0, up)               # kh = 0: row r-1
        dn = pltpu.roll(inp, shift=M - 1, axis=0)                     # dn[r] = inp[r+1]
        stk_ref[:, 2 * WC:3 * WC] = jnp.where(bot_edge, 0.0, dn)      # kh = 2: row r+1
        # Single MXU matmul per conv: (M, 3*W*C) @ (3*W*C, W*C), f32 accumulate.
        y = jnp.dot(stk_ref[...], wb_ref[...], preferred_element_type=jnp.float32)
        return jnp.maximum(y + b_ref[...], 0.0)

    y = conv3x3_relu(x, wb1_ref, b1_ref)        # conv1 + ReLU
    y = conv3x3_relu(y, wb2_ref, b2_ref)        # conv2 + ReLU
    o_ref[...] = (y + x).astype(o_ref.dtype)    # residual add, full-lane store


def _pack_banded_weight(w_oihw, W):
    """OIHW (C,C,3,3) conv weight -> block-banded (3*W*C_in, W*C_out) matmul weight.

    Row index = kh*(W*C_in) + wi*C_in + ci, col index = wo*C_out + co.
    Entry = w_hwio[kh, wi-wo+1, ci, co] when |wi - wo| <= 1, else 0 -- i.e. the
    horizontal taps and the width zero-padding are folded into the weight.
    """
    C_out, C_in, KH, KW = w_oihw.shape
    w_hwio = jnp.transpose(w_oihw, (2, 3, 1, 0)).astype(jnp.float32)   # (3,3,Cin,Cout)
    blocks = []
    for kh in range(KH):
        band = jnp.zeros((W, C_in, W, C_out), jnp.float32)
        for kw in range(KW):
            # eye[wi, wo] = 1  iff  wi - wo == kw - 1
            eye = jnp.eye(W, k=1 - kw, dtype=jnp.float32)
            band = band + jnp.einsum('wv,io->wivo', eye, w_hwio[kh, kw])
        blocks.append(band.reshape(W * C_in, W * C_out))
    return jnp.concatenate(blocks, axis=0)              # (3*W*C_in, W*C_out)


def _pick_images_per_block(N, H, target_rows=128):
    """Images folded into one matmul block.

    Fill ~target_rows MXU rows (M = NB*H ~= 128), but keep at least two grid steps
    when the batch allows so v7x's two TensorCores each get a share of the batch.
    """
    nb = max(1, min(N, target_rows // max(H, 1)))
    if N >= 2 and N // nb < 2:
        nb = max(1, N // 2)
    while N % nb:
        nb -= 1
    return nb


def residual_block(x_nchw, w1, b1, w2, b2):
    """x: (N,C,H,W) f32; w*: (C,C,3,3) OIHW; b*: (C,). Returns NCHW."""
    N, C, H, W = x_nchw.shape
    WC = W * C
    NB = _pick_images_per_block(N, H)
    G = N // NB
    M = NB * H

    # Row-packed, lane-dense layout (N*H, W*C): last dim maps to TPU lanes, the batch
    # folds straight into matmul M rows without any in-kernel reshape.
    x_packed = jnp.transpose(x_nchw, (0, 2, 3, 1)).reshape(N * H, WC)
    wb1 = _pack_banded_weight(w1, W)                    # (3*WC, WC)
    wb2 = _pack_banded_weight(w2, W)
    b1p = jnp.tile(b1.astype(jnp.float32), W).reshape(1, WC)
    b2p = jnp.tile(b2.astype(jnp.float32), W).reshape(1, WC)

    # VMEM budget: in/out blocks double-buffered, constants single-buffered, + scratch.
    vmem_est = (2 * 2 * M * WC * 4          # x / o blocks, double-buffered
                + 2 * (3 * WC) * WC * 4     # banded weights (pl.Buffered(1))
                + 2 * WC * 4                # biases
                + M * 3 * WC * 4)           # staging scratch
    if vmem_est > (48 << 20):
        # TODO(synk): switch to C-as-lanes im2col ((N*H*W, 9C) @ (9C, C)) for large
        # W*C -- the banded weight grows as 12*(W*C)^2 bytes and is only 3/W dense,
        # which exceeds v7x's 64 MiB VMEM and wastes MXU FLOPs at production widths.
        raise NotImplementedError("W*C too large for the banded-weight formulation")
    vmem_limit = int(vmem_est * 2) if vmem_est * 2 > (16 << 20) else None

    # Grid-invariant operands: single-buffered, fetched once.
    w_spec = pl.BlockSpec((3 * WC, WC), lambda n: (0, 0), pipeline_mode=pl.Buffered(1))
    b_spec = pl.BlockSpec((1, WC), lambda n: (0, 0), pipeline_mode=pl.Buffered(1))

    out = pl.pallas_call(
        functools.partial(_residual_block_kernel, img_rows=H),
        out_shape=jax.ShapeDtypeStruct((N * H, WC), x_packed.dtype),
        grid=(G,),
        in_specs=[
            pl.BlockSpec((M, WC), lambda n: (n, 0)),
            w_spec, b_spec, w_spec, b_spec,
        ],
        out_specs=pl.BlockSpec((M, WC), lambda n: (n, 0)),
        scratch_shapes=[pltpu.VMEM((M, 3 * WC), jnp.float32)],
        compiler_params=pltpu.CompilerParams(
            dimension_semantics=("parallel",),
            vmem_limit_bytes=vmem_limit,
        ),
    )(x_packed, wb1, b1p, wb2, b2p)

    return jnp.transpose(out.reshape(N, H, W, C), (0, 3, 1, 2))


def _reference(x, w1, b1, w2, b2):
    dn = jax.lax.conv_dimension_numbers(x.shape, w1.shape, ("NCHW", "OIHW", "NCHW"))
    y = jax.lax.conv_general_dilated(x, w1, (1, 1), ((1, 1), (1, 1)), dimension_numbers=dn)
    y = jnp.maximum(y + b1.reshape(1, -1, 1, 1), 0.0)
    y = jax.lax.conv_general_dilated(y, w2, (1, 1), ((1, 1), (1, 1)), dimension_numbers=dn)
    y = jnp.maximum(y + b2.reshape(1, -1, 1, 1), 0.0)
    return y + x


if __name__ == "__main__":
    key = jax.random.PRNGKey(0)
    # Main shape fills M=NB*H=128 MXU rows with a 2-step parallel grid (v7x megacore);
    # the second shape exercises the small-batch path (NB=1, grid=2).
    for (N, C, H, W) in [(16, 8, 16, 16), (2, 8, 16, 16)]:
        kx, k1, k2, k3, k4, key = jax.random.split(key, 6)
        bound = 1.0 / (C * 3 * 3) ** 0.5   # PyTorch default Conv2d init range
        x = jax.random.normal(kx, (N, C, H, W), jnp.float32)
        w1 = jax.random.uniform(k1, (C, C, 3, 3), jnp.float32, -bound, bound)
        b1 = jax.random.uniform(k2, (C,), jnp.float32, -bound, bound)
        w2 = jax.random.uniform(k3, (C, C, 3, 3), jnp.float32, -bound, bound)
        b2 = jax.random.uniform(k4, (C,), jnp.float32, -bound, bound)

        out = jax.block_until_ready(residual_block(x, w1, b1, w2, b2))

        ref = _reference(x, w1, b1, w2, b2)
        assert out.shape == ref.shape == (N, C, H, W)
        max_err = float(jnp.max(jnp.abs(out - ref)))
        # f32 end-to-end, checked at atol/rtol = 2e-4.
        assert jnp.allclose(out, ref, atol=2e-4, rtol=2e-4), (N, max_err)
    print("KERNEL_OK")
</pallas_src>

<mosaic_0001>
module attributes {stable_mosaic.version = 11 : i64} {
  func.func @_residual_block_kernel(%arg0: i32, %arg1: memref<128x128xf32, #tpu.memory_space<vmem>>, %arg2: memref<384x128xf32, #tpu.memory_space<vmem>>, %arg3: memref<1x128xf32, #tpu.memory_space<vmem>>, %arg4: memref<384x128xf32, #tpu.memory_space<vmem>>, %arg5: memref<1x128xf32, #tpu.memory_space<vmem>>, %arg6: memref<128x128xf32, #tpu.memory_space<vmem>>, %arg7: memref<128x384xf32, #tpu.memory_space<vmem>>) attributes {dimension_semantics = [#tpu.dimension_semantics<parallel>], iteration_bounds = array<i64: 2>, scalar_prefetch = 0 : i64, scratch_operands = 1 : i64, tpu.core_type = #tpu.core_type<tc>, window_params = [{transform_indices = @transform_0, window_bounds = array<i64: 128, 128>}, {pipeline_mode = #tpu.pipeline_mode<synchronous>, transform_indices = @transform_1, window_bounds = array<i64: 384, 128>}, {pipeline_mode = #tpu.pipeline_mode<synchronous>, transform_indices = @transform_2, window_bounds = array<i64: 1, 128>}, {pipeline_mode = #tpu.pipeline_mode<synchronous>, transform_indices = @transform_3, window_bounds = array<i64: 384, 128>}, {pipeline_mode = #tpu.pipeline_mode<synchronous>, transform_indices = @transform_4, window_bounds = array<i64: 1, 128>}, {transform_indices = @transform_5, window_bounds = array<i64: 128, 128>}]} {
    %c0 = arith.constant 0 : index
    %c0_0 = arith.constant 0 : index
    %0 = vector.load %arg1[%c0, %c0_0] : memref<128x128xf32, #tpu.memory_space<vmem>>, vector<128x128xf32>
    %1 = tpu.iota {dimensions = array<i32: 0>} : vector<128x128xi32>
    %c16_i32 = arith.constant 16 : i32
    %c0_i32 = arith.constant 0 : i32
    %2 = arith.cmpi eq, %c16_i32, %c0_i32 : i32
    %c1_i32 = arith.constant 1 : i32
    %3 = arith.select %2, %c1_i32, %c16_i32 : i32
    %4 = vector.broadcast %3 : i32 to vector<128x128xi32>
    %5 = arith.remsi %1, %4 : vector<128x128xi32>
    %c0_i32_1 = arith.constant 0 : i32
    %6 = vector.broadcast %c0_i32_1 : i32 to vector<128x128xi32>
    %7 = arith.cmpi ne, %5, %6 : vector<128x128xi32>
    %c0_i32_2 = arith.constant 0 : i32
    %8 = vector.broadcast %c0_i32_2 : i32 to vector<128x128xi32>
    %9 = arith.cmpi slt, %5, %8 : vector<128x128xi32>
    %c0_i32_3 = arith.constant 0 : i32
    %10 = arith.cmpi slt, %3, %c0_i32_3 : i32
    %11 = vector.broadcast %10 : i1 to vector<128x128xi1>
    %12 = vector.broadcast %11 : vector<128x128xi1> to vector<128x128xi1>
    %13 = arith.xori %9, %12 : vector<128x128xi1>
    %14 = arith.andi %13, %7 : vector<128x128xi1>
    %15 = vector.broadcast %3 : i32 to vector<128x128xi32>
    %16 = arith.addi %5, %15 : vector<128x128xi32>
    %17 = arith.select %14, %16, %5 : vector<128x128xi1>, vector<128x128xi32>
    %c0_i32_4 = arith.constant 0 : i32
    %18 = vector.broadcast %c0_i32_4 : i32 to vector<128x128xi32>
    %19 = arith.cmpi eq, %17, %18 : vector<128x128xi32>
    %c15_i32 = arith.constant 15 : i32
    %20 = vector.broadcast %c15_i32 : i32 to vector<128x128xi32>
    %21 = arith.cmpi eq, %17, %20 : vector<128x128xi32>
    %c0_5 = arith.constant 0 : index
    %c128 = arith.constant 128 : index
    %22 = vector.load %arg7[%c0_5, %c128] : memref<128x384xf32, #tpu.memory_space<vmem>>, vector<128x128xf32>
    tpu.vector_store %arg7[%c0_5, %c128], %0 {strides = array<i32>} : memref<128x384xf32, #tpu.memory_space<vmem>>, vector<128x128xf32>,
    %c1_i32_6 = arith.constant 1 : i32
    %23 = tpu.dynamic_rotate %0 by %c1_i32_6 dim 0 : vector<128x128xf32>, i32 -> vector<128x128xf32>
    %cst = arith.constant 0.000000e+00 : f32
    %24 = vector.broadcast %cst : f32 to vector<128x128xf32>
    %25 = arith.select %19, %24, %23 : vector<128x128xi1>, vector<128x128xf32>
    %c0_7 = arith.constant 0 : index
    %c0_8 = arith.constant 0 : index
    %26 = vector.load %arg7[%c0_7, %c0_8] : memref<128x384xf32, #tpu.memory_space<vmem>>, vector<128x128xf32>
    tpu.vector_store %arg7[%c0_7, %c0_8], %25 {strides = array<i32>} : memref<128x384xf32, #tpu.memory_space<vmem>>, vector<128x128xf32>,
    %c127_i32 = arith.constant 127 : i32
    %27 = tpu.dynamic_rotate %0 by %c127_i32 dim 0 : vector<128x128xf32>, i32 -> vector<128x128xf32>
    %cst_9 = arith.constant 0.000000e+00 : f32
    %28 = vector.broadcast %cst_9 : f32 to vector<128x128xf32>
    %29 = arith.select %21, %28, %27 : vector<128x128xi1>, vector<128x128xf32>
    %c0_10 = arith.constant 0 : index
    %c256 = arith.constant 256 : index
    %30 = vector.load %arg7[%c0_10, %c256] : memref<128x384xf32, #tpu.memory_space<vmem>>, vector<128x128xf32>
    tpu.vector_store %arg7[%c0_10, %c256], %29 {strides = array<i32>} : memref<128x384xf32, #tpu.memory_space<vmem>>, vector<128x128xf32>,
    %c0_11 = arith.constant 0 : index
    %c0_12 = arith.constant 0 : index
    %31 = vector.load %arg7[%c0_11, %c0_12] : memref<128x384xf32, #tpu.memory_space<vmem>>, vector<128x384xf32>
    %c0_13 = arith.constant 0 : index
    %c0_14 = arith.constant 0 : index
    %32 = vector.load %arg2[%c0_13, %c0_14] : memref<384x128xf32, #tpu.memory_space<vmem>>, vector<384x128xf32>
    %cst_15 = arith.constant dense<0.000000e+00> : vector<128x128xf32>
    %33 = tpu.matmul %31, %32, %cst_15 {dimension_numbers = #tpu.dot_dimension_numbers<[1], [0], [0], [1], [0, 0, 1, 1], [], []>} : vector<128x384xf32>, vector<384x128xf32>, vector<128x128xf32> -> vector<128x128xf32>
    %c0_16 = arith.constant 0 : index
    %c0_17 = arith.constant 0 : index
    %34 = vector.load %arg3[%c0_16, %c0_17] : memref<1x128xf32, #tpu.memory_space<vmem>>, vector<1x128xf32>
    %35 = vector.broadcast %34 : vector<1x128xf32> to vector<128x128xf32>
    %36 = arith.addf %33, %35 : vector<128x128xf32>
    %cst_18 = arith.constant 0.000000e+00 : f32
    %37 = vector.broadcast %cst_18 : f32 to vector<128x128xf32>
    %38 = arith.maximumf %36, %37 : vector<128x128xf32>
    %c0_19 = arith.constant 0 : index
    %c128_20 = arith.constant 128 : index
    %39 = vector.load %arg7[%c0_19, %c128_20] : memref<128x384xf32, #tpu.memory_space<vmem>>, vector<128x128xf32>
    tpu.vector_store %arg7[%c0_19, %c128_20], %38 {strides = array<i32>} : memref<128x384xf32, #tpu.memory_space<vmem>>, vector<128x128xf32>,
    %c1_i32_21 = arith.constant 1 : i32
    %40 = tpu.dynamic_rotate %38 by %c1_i32_21 dim 0 : vector<128x128xf32>, i32 -> vector<128x128xf32>
    %cst_22 = arith.constant 0.000000e+00 : f32
    %41 = vector.broadcast %cst_22 : f32 to vector<128x128xf32>
    %42 = arith.select %19, %41, %40 : vector<128x128xi1>, vector<128x128xf32>
    %c0_23 = arith.constant 0 : index
    %c0_24 = arith.constant 0 : index
    %43 = vector.load %arg7[%c0_23, %c0_24] : memref<128x384xf32, #tpu.memory_space<vmem>>, vector<128x128xf32>
    tpu.vector_store %arg7[%c0_23, %c0_24], %42 {strides = array<i32>} : memref<128x384xf32, #tpu.memory_space<vmem>>, vector<128x128xf32>,
    %c127_i32_25 = arith.constant 127 : i32
    %44 = tpu.dynamic_rotate %38 by %c127_i32_25 dim 0 : vector<128x128xf32>, i32 -> vector<128x128xf32>
    %cst_26 = arith.constant 0.000000e+00 : f32
    %45 = vector.broadcast %cst_26 : f32 to vector<128x128xf32>
    %46 = arith.select %21, %45, %44 : vector<128x128xi1>, vector<128x128xf32>
    %c0_27 = arith.constant 0 : index
    %c256_28 = arith.constant 256 : index
    %47 = vector.load %arg7[%c0_27, %c256_28] : memref<128x384xf32, #tpu.memory_space<vmem>>, vector<128x128xf32>
    tpu.vector_store %arg7[%c0_27, %c256_28], %46 {strides = array<i32>} : memref<128x384xf32, #tpu.memory_space<vmem>>, vector<128x128xf32>,
    %c0_29 = arith.constant 0 : index
    %c0_30 = arith.constant 0 : index
    %48 = vector.load %arg7[%c0_29, %c0_30] : memref<128x384xf32, #tpu.memory_space<vmem>>, vector<128x384xf32>
    %c0_31 = arith.constant 0 : index
    %c0_32 = arith.constant 0 : index
    %49 = vector.load %arg4[%c0_31, %c0_32] : memref<384x128xf32, #tpu.memory_space<vmem>>, vector<384x128xf32>
    %cst_33 = arith.constant dense<0.000000e+00> : vector<128x128xf32>
    %50 = tpu.matmul %48, %49, %cst_33 {dimension_numbers = #tpu.dot_dimension_numbers<[1], [0], [0], [1], [0, 0, 1, 1], [], []>} : vector<128x384xf32>, vector<384x128xf32>, vector<128x128xf32> -> vector<128x128xf32>
    %c0_34 = arith.constant 0 : index
    %c0_35 = arith.constant 0 : index
    %51 = vector.load %arg5[%c0_34, %c0_35] : memref<1x128xf32, #tpu.memory_space<vmem>>, vector<1x128xf32>
    %52 = vector.broadcast %51 : vector<1x128xf32> to vector<128x128xf32>
    %53 = arith.addf %50, %52 : vector<128x128xf32>
    %cst_36 = arith.constant 0.000000e+00 : f32
    %54 = vector.broadcast %cst_36 : f32 to vector<128x128xf32>
    %55 = arith.maximumf %53, %54 : vector<128x128xf32>
    %56 = arith.addf %55, %0 : vector<128x128xf32>
    %c0_37 = arith.constant 0 : index
    %c0_38 = arith.constant 0 : index
    %57 = vector.load %arg6[%c0_37, %c0_38] : memref<128x128xf32, #tpu.memory_space<vmem>>, vector<128x128xf32>
    tpu.vector_store %arg6[%c0_37, %c0_38], %56 {strides = array<i32>} : memref<128x128xf32, #tpu.memory_space<vmem>>, vector<128x128xf32>,
    return
  }
  func.func @transform_0(%arg0: i32) -> (i32, i32) {
    %c0_i32 = arith.constant 0 : i32
    %c0_i32_0 = arith.constant 0 : i32
    return %arg0, %c0_i32 : i32, i32
  }
  func.func @transform_1(%arg0: i32) -> (i32, i32) {
    %c0_i32 = arith.constant 0 : i32
    %c0_i32_0 = arith.constant 0 : i32
    %c0_i32_1 = arith.constant 0 : i32
    return %c0_i32, %c0_i32_0 : i32, i32
  }
  func.func @transform_2(%arg0: i32) -> (i32, i32) {
    %c0_i32 = arith.constant 0 : i32
    %c0_i32_0 = arith.constant 0 : i32
    %c0_i32_1 = arith.constant 0 : i32
    return %c0_i32, %c0_i32_0 : i32, i32
  }
  func.func @transform_3(%arg0: i32) -> (i32, i32) {
    %c0_i32 = arith.constant 0 : i32
    %c0_i32_0 = arith.constant 0 : i32
    %c0_i32_1 = arith.constant 0 : i32
    return %c0_i32, %c0_i32_0 : i32, i32
  }
  func.func @transform_4(%arg0: i32) -> (i32, i32) {
    %c0_i32 = arith.constant 0 : i32
    %c0_i32_0 = arith.constant 0 : i32
    %c0_i32_1 = arith.constant 0 : i32
    return %c0_i32, %c0_i32_0 : i32, i32
  }
  func.func @transform_5(%arg0: i32) -> (i32, i32) {
    %c0_i32 = arith.constant 0 : i32
    %c0_i32_0 = arith.constant 0 : i32
    return %arg0, %c0_i32 : i32, i32
  }
}

</mosaic_0001>

<bundles_post_ra>
// kernel: tpu_custom_call.1
= control target key start
LH: loop header
LB: loop body
LE: loop exit
PB: predicated region body
PF: predicated region fallthrough
CT: control target
= control target key end

     0   :  { %10 = vsyncpa [#allocation4], 0  ;;  %s3570_s0 = inlined_call_operand.hbm [shape: f32[256,128], index: 0, kind: input, shape index: {}]   ;;  %s3571_s1 = inlined_call_operand.hbm [shape: f32[384,128], index: 1, kind: input, shape index: {}]   ;;  %s3572_s2 = inlined_call_operand.vmem [shape: f32[1,128], index: 2, kind: input, shape index: {}]   ;;  %s3573_s3 = inlined_call_operand.hbm [shape: f32[384,128], index: 3, kind: input, shape index: {}]   ;;  %s3574_s4 = inlined_call_operand.vmem [shape: f32[1,128], index: 4, kind: input, shape index: {}]   ;;  %s3575_s5 = inlined_call_operand.hbm [shape: f32[256,128], index: 5, kind: output, shape index: {}]  }
   0x1   :  { %12 = vsyncpa [#allocation4 + $0x1], 0 }
   0x2   :  { %13 = vsyncpa [#allocation7], 0 }
   0x3   :  { %14 = vsyncpa [#allocation5], 0 }
   0x4   :  { %16 = vsyncpa [#allocation5 + $0x1], 0  ;;  %s2626_s18 = smov 0   ;;  %s2628_s19 = smov 0  }
   0x5   :  { %s2630_s20 = smov 0   ;;  %s2632_s21 = smov 0  }
   0x6 LB: > { %s2647_s22 = sadd.s32 4294967295, %s2586_s21   ;;  %s1777_s23 = sadd.s32 4294967294, %s2586_s21   ;;  %s2586_s21 = sphi %s2632_s21, %s3659_s21   ;;  %s2582_s20 = sphi %s2630_s20, %s3658_s20   ;;  %s2578_s19 = sphi %s2628_s19, %s3657_s19   ;;  %s2574_s18 = sphi %s2626_s18, %s3656_s18  }
   0x7   : > { %p42_p0 = scmp.ne.s32.totalorder %s2578_s19, %s2574_s18  ;;  %p3576_p1 = scmp.eq.s32.totalorder %s2647_s22, 0 }
   0x8   : > { %p156_p3 = scmp.eq.s32.totalorder %s1777_s23, 1  ;;  %p1778_p5 = scmp.ge.s32.totalorder %s2586_s21, 1 }
   0x9   : > { %p2656_p4 = por %p3576_p1, %p42_p0  ;;  %p163_p7 = scmp.lt.s32.totalorder %s2586_s21, 3 }
   0xa   : > { %p2661_p6 = por %p156_p3, %p42_p0  ;;  %s2588_s27 = smov [#allocation6]  }
   0xb   : > { %s3583_s24 = scalar_select %p2656_p4, 1, 0 }
   0xc   : > { %s3584_s25 = scalar_select %p2661_p6, 1, 0 }
   0xd   : > { %p2666_p8 = pnand %p1778_p5, %p163_p7  ;;  %s175_s28 = sshll.u32 %s2588_s27, 4  ;;  %s2670_s28 = int_to_ptr.vmem [resolvable:$true] %s175_s28 }
   0xe   : > { %s2589_s30 = smov [#allocation8]   ;;  %s2430_s9 = scalar_lea.hbm %s3571_s1, 6144 }
   0xf   : > { %p2339_p9 = pneg %p2666_p8  ;;  %s191_s6 = sshll.u32 %s2589_s30, 4  ;;  %s2681_s6 = int_to_ptr.vmem [resolvable:$true] %s191_s6 }
  0x10   : > { %p2431_p12 = scmp.ne.s32.totalorder %s3571_s1, %s2430_s9  ;;  %p2437_p5 = scmp.lt.u32.totalorder %s2430_s9, %s3571_s1 }
  0x11   : > { %p2677_p11 = pnand %p2339_p9, %p3576_p1 }
  0x13   : > { %p2432_p13 = pneg %p2677_p11 }
  0x15   : > { %p2433_p0 = pnand %p2432_p13, %p2431_p12 }
  0x17   : > { %p2434_p3 = pneg %p2433_p0 }
  0x19   : > { %p2439_p7 = pnand %p2437_p5, %p2434_p3 }
  0x1b   : > { %2442 = shalt.err (!%p2439_p7)
}
  0x1c   : > { %s2443_s14 = scalar_lea.vmem %s2670_s28, 6144  ;;  %p2451_p2 = scmp.lt.s32.totalorder %s2670_s28, %s2670_s28 }
  0x1d   : > { %p2444_p9 = scmp.ne.s32.totalorder %s2670_s28, %s2443_s14  ;;  %p2452_p12 = scmp.lt.s32.totalorder %s2443_s14, %s2443_s14 }
  0x1f   : > { %p2446_p10 = pnand %p2444_p9, %p2432_p13  ;;  %p2453_p0 = por %p2452_p12, %p2451_p2 }
  0x21   : > { %p2447_p1 = pneg %p2446_p10 }
  0x23   : > { %p2454_p6 = pnand %p2453_p0, %p2447_p1 }
  0x25   : > { %2457 = shalt.err (!%p2454_p6)
}
  0x26   : > { %s2590_s15 = smov 128   ;;  %s2591_s16 = smov 8  }
  0x27   : > { %2342 = dma.hbm_to_vmem [thread:$0]  (!%p2677_p11), %s3571_s1, 6144, %s2670_s28, [#allocation7], %s2590_s15, %s2590_s15, %s2591_s16  }
  0x28   : > { %s2458_s7 = scalar_lea.hbm %s3573_s3, 6144 }
  0x29   : > { %p2459_p1 = scmp.ne.s32.totalorder %s3573_s3, %s2458_s7  ;;  %p2465_p10 = scmp.lt.u32.totalorder %s2458_s7, %s3573_s3 }
  0x2b   : > { %p2461_p2 = pnand %p2459_p1, %p2432_p13 }
  0x2d   : > { %p2462_p6 = pneg %p2461_p2 }
  0x2f   : > { %p2467_p3 = pnand %p2465_p10, %p2462_p6 }
  0x31   : > { %2470 = shalt.err (!%p2467_p3)
}
  0x32   : > { %s2471_s28 = scalar_lea.vmem %s2681_s6, 6144  ;;  %p2479_p12 = scmp.lt.s32.totalorder %s2681_s6, %s2681_s6 }
  0x33   : > { %p2472_p5 = scmp.ne.s32.totalorder %s2681_s6, %s2471_s28  ;;  %p2480_p0 = scmp.lt.s32.totalorder %s2471_s28, %s2471_s28 }
  0x35   : > { %p2474_p7 = pnand %p2472_p5, %p2432_p13  ;;  %p2481_p1 = por %p2480_p0, %p2479_p12 }
  0x37   : > { %p2475_p9 = pneg %p2474_p7 }
  0x39   : > { %p2482_p2 = pnand %p2481_p1, %p2475_p9 }
  0x3b   : > { %2485 = shalt.err (!%p2482_p2)
}
  0x3c   : > { %2345 = dma.hbm_to_vmem [thread:$0]  (!%p2677_p11), %s3573_s3, 6144, %s2681_s6, [#allocation7], %s2590_s15, %s2590_s15, %s2591_s16  }
  0x3d   : > { %s2742_s29 = sadd.s32 1, %s2586_s21   ;;  %s29_s14 = sadd.s32 1, %s2582_s20 }
  0x3e   : > { %s26_s17 = ssub.s32 %s2586_s21, %s2742_s29  ;;  %p36_p13 = scmp.ne.s32.totalorder %s2582_s20, %s2578_s19 }
  0x3f   : > { %p27_p6 = scmp.eq.s32.totalorder %s26_s17, 0  ;;  %p37_p10 = scmp.eq.s32.totalorder %s2586_s21, 0 }
  0x40   : > { %p3587_p3 = scmp.eq.s32.totalorder %s2647_s22, 1  ;;  %p2356_p7 = scmp.lt.s32.totalorder %s2586_s21, 2 }
  0x41   : > { %s2758_s27 = scalar_select %p27_p6, %s2582_s20, %s29_s14  }
  0x42   : > { %p2752_p5 = por %p3587_p3, %p36_p13  ;;  %p38_p9 = por %p37_p10, %p36_p13 }
  0x43   : > { %s208_s30 = sand.u32 1, %s2582_s20   ;;  %s1797_s6 = sshll.u32 %s2586_s21, 11 }
  0x44   : > { %s3588_s23 = scalar_select %p2752_p5, 1, 0 }
  0x45   : > { %s1782_s7 = sshll.u32 %s208_s30, 7  ;;  %s2765_s10 = scalar_lea.hbm %s3570_s0, %s1797_s6 }
  0x46   : > { %s212_s11 = scalar_lea.vmem [#allocation3], %s1782_s7  ;;  %p2769_p11 = pnand %p2356_p7, %p38_p9 }
  0x47   : > { %s219_s28 = sshll.u32 %s212_s11, 4  ;;  %s2773_s13 = scalar_lea.sflag [#allocation4], %s208_s30  ;;  %s2767_s28 = int_to_ptr.vmem [resolvable:$true] %s219_s28 }
  0x48   : > { %s2486_s14 = scalar_lea.hbm %s2765_s10, 2048  ;;  %p2488_p0 = pneg %p2769_p11 }
  0x49   : > { %p2487_p12 = scmp.ne.s32.totalorder %s2765_s10, %s2486_s14  ;;  %s2491_s6 = scalar_lea.hbm %s3570_s0, 4096 }
  0x4a   : > { %p2492_p13 = scmp.lt.u32.totalorder %s2765_s10, %s3570_s0  ;;  %p2493_p6 = scmp.lt.u32.totalorder %s2491_s6, %s2486_s14 }
  0x4b   : > { %p2489_p1 = pnand %p2488_p0, %p2487_p12  ;;  %p2495_p3 = scmp.lt.u32.totalorder %s2486_s14, %s2765_s10 }
  0x4c   : > { %p2494_p10 = por %p2493_p6, %p2492_p13 }
  0x4d   : > { %p2490_p2 = pneg %p2489_p1 }
  0x4e   : > { %p2496_p7 = por %p2495_p3, %p2494_p10 }
  0x50   : > { %p2497_p9 = pnand %p2496_p7, %p2490_p2 }
  0x52   : > { %2500 = shalt.err (!%p2497_p9)
}
  0x53   : > { %s2501_s30 = scalar_lea.vmem %s2767_s28, 2048  ;;  %s2592_s11 = smov [#allocation3]  }
  0x54   : > { %p2502_p12 = scmp.ne.s32.totalorder %s2767_s28, %s2501_s30  ;;  %s2506_s17 = sshll.u32 %s2592_s11, 4  ;;  %s2507_s17 = int_to_ptr.vmem [resolvable:$false] %s2506_s17 }
  0x55   : > { %s2508_s7 = scalar_lea.vmem %s2507_s17, 4096  ;;  %p2509_p4 = scmp.lt.s32.totalorder %s2767_s28, %s2507_s17 }
  0x56   : > { %p2504_p1 = pnand %p2502_p12, %p2488_p0  ;;  %p2510_p13 = scmp.lt.s32.totalorder %s2508_s7, %s2501_s30 }
  0x58   : > { %p2505_p5 = pneg %p2504_p1  ;;  %p2511_p6 = por %p2510_p13, %p2509_p4 }
  0x5a   : > { %p2512_p10 = pnand %p2511_p6, %p2505_p5 }
  0x5c   : > { %2515 = shalt.err (!%p2512_p10)
}
  0x5d   : > { %2349 = dma.hbm_to_vmem [thread:$0]  (!%p2769_p11), %s2765_s10, 2048, %s2767_s28, %s2773_s13, %s2590_s15, %s2590_s15, %s2591_s16  }
  0x5e   : > { %231 = sbr.rel (%p2666_p8) target bundleno = 722 (0x2d2), region = 40  ;;  %s2807_s14 = sand.u32 (!%p2666_p8), 1, %s2578_s19  }
  0x5f   : > { %s1786_s6 = sshll.u32 (!%p2666_p8), %s2807_s14, 7  ;;  %s234_s8 = scalar_lea.sflag (!%p2666_p8), [#allocation4], %s2807_s14 }
  0x60   : > { %s2813_s12 = scalar_lea.vmem (!%p2666_p8), [#allocation3], %s1786_s6  ;;  %p3590_p4 = scmp.ne.s32.totalorder (!%p2666_p8), %s3583_s24, 0 }
  0x65   : > { %2561 = dma.done.wait (%p3590_p4), %s234_s8, 2048  }
  0x66   : > { %2563 = vsyncadd (%p3590_p4), %s234_s8, 4294965248  ;;  %p3591_p5 = scmp.eq.s32.totalorder %s2647_s22, 0 }
  0x68   : > { %2565 = dma.done.wait (%p3591_p5), [#allocation7], 12288   ;;  %p3592_p8 = pmov %p3591_p5 }
  0x69   : > { %v290_v0 = vlaneseq  ;;  %v741_v9 = vld [vmem:[#allocation6 + $0x80] sm:$0xff]  ;;  %v742_v10 = vld [vmem:[#allocation6 + $0x88] sm:$0xff]  ;;  %v743_v16 = vld [vmem:[#allocation6 + $0x90] sm:$0xff]  ;;  %s3461_s10 = scalar_lea.vmem [#allocation9], %s1786_s6  ;;  %s1798_s28 = sshll.u32 %s2647_s22, 11 }
  0x6a   : > { %2567 = vsyncadd (%p3592_p8), [#allocation7], 4294955008  ;;  %v725_v11 = vld [vmem:[#allocation6] sm:$0xff]  ;;  %v2199_v14 = vpack.c.bf16 %v742_v10, %v741_v9  ;;  %v726_v15 = vld [vmem:[#allocation6 + $0x8] sm:$0xff]  ;;  %s1685_s13 = sshll.u32 %s3461_s10, 4  ;;  %s3522_s11 = scalar_lea.hbm %s3575_s5, %s1798_s28  ;;  %s3524_s13 = int_to_ptr.vmem [resolvable:$true] %s1685_s13 }
  0x6b   : > { %v2823_v1 = vshrl.u32 %v290_v0, 7  ;;  %v744_v17 = vld [vmem:[#allocation6 + $0x98] sm:$0xff]  ;;  %v2201_v20 = vpack.c.bf16 %v726_v15, %v725_v11  ;;  %v757_v22 = vld [vmem:[#allocation6 + $0x100] sm:$0xff]  ;;  %v758_v23 = vld [vmem:[#allocation6 + $0x108] sm:$0xff]  ;;  %s1672_s17 = scalar_lea.sflag [#allocation5], %s2807_s14  ;;  %s2516_s7 = scalar_lea.vmem %s3524_s13, 2048 }
  0x6c   : > { %v2203_v21 = vpack.c.bf16 %v744_v17, %v743_v16  ;;  %v727_v24 = vld [vmem:[#allocation6 + $0x10] sm:$0xff]  ;;  %2200 = vmatprep.subr.bf16.mxu0 %v2199_v14  ;;  %v2231_v26 = vpack.c.bf16 %v758_v23, %v757_v22  ;;  %v728_v27 = vld [vmem:[#allocation6 + $0x18] sm:$0xff]  ;;  %v745_v28 = vld [vmem:[#allocation6 + $0xa0] sm:$0xff]  ;;  %p2517_p11 = scmp.ne.s32.totalorder %s3524_s13, %s2516_s7  ;;  %p3653_p0 = scmp.ne.s32.totalorder %s3588_s23, 0 }
  0x6d   : > { %v311_v2 = vand.u32 15, %v2823_v1  ;;  %v2827_v3 = vadd.s32 8, %v2823_v1  ;;  %v2830_v4 = vadd.s32 16, %v2823_v1  ;;  %v2833_v5 = vadd.s32 24, %v2823_v1  ;;  %v746_v29 = vld [vmem:[#allocation6 + $0xa8] sm:$0xff]  ;;  %2202 = vmatpush3.bf16.msra.mxu0 %v2201_v20  ;;  %v759_v31 = vld [vmem:[#allocation6 + $0x110] sm:$0xff] }
  0x6e   : > { %v2836_v6 = vadd.s32 32, %v2823_v1  ;;  %v2839_v7 = vadd.s32 40, %v2823_v1  ;;  %v2844_v13 = vadd.s32 48, %v2823_v1  ;;  %v2205_v30 = vpack.c.bf16 %v728_v27, %v727_v24  ;;  %v760_v32 = vld [vmem:[#allocation6 + $0x118] sm:$0xff]  ;;  %2204 = vmatprep.subr.bf16.mxu0 %v2203_v21  ;;  %2232 = vmatprep.subr.bf16.mxu1 %v2231_v26  ;;  %v729_v35 = vld [vmem:[#allocation6 + $0x20] sm:$0xff]  ;;  %v730_v36 = vld [vmem:[#allocation6 + $0x28] sm:$0xff]  ;;  %p2518_p2 = pnand %p2517_p11, %p3653_p0 }
  0x6f   : > { %v318_v8 = vand.u32 15, %v2827_v3  ;;  %v325_v12 = vand.u32 15, %v2830_v4  ;;  %v332_v18 = vand.u32 15, %v2833_v5  ;;  %v2207_v33 = vpack.c.bf16 %v746_v29, %v745_v28  ;;  %v747_v37 = vld [vmem:[#allocation6 + $0xb0] sm:$0xff]  ;;  %2234 = vmatpush3.bf16.msra.mxu1 %v2231_v26  ;;  %v748_v40 = vld [vmem:[#allocation6 + $0xb8] sm:$0xff]  ;;  %v761_v41 = vld [vmem:[#allocation6 + $0x120] sm:$0xff] }
  0x70   : > { %v339_v19 = vand.u32 15, %v2836_v6  ;;  %v346_v25 = vand.u32 15, %v2839_v7  ;;  %v2235_v34 = vpack.c.bf16 %v760_v32, %v759_v31  ;;  %v353_v38 = vand.u32 15, %v2844_v13  ;;  %v762_v42 = vld [vmem:[#allocation6 + $0x128] sm:$0xff]  ;;  %v763_v48 = vld [vmem:[#allocation6 + $0x130] sm:$0xff]  ;;  %v764_v49 = vld [vmem:[#allocation6 + $0x138] sm:$0xff]  ;;  %p2519_p3 = pneg %p2518_p2 }
  0x71   : > { %v2851_v39 = vadd.s32 56, %v2823_v1  ;;  %v2854_v43 = vadd.s32 64, %v2823_v1  ;;  %v2857_v44 = vadd.s32 72, %v2823_v1  ;;  %v2239_v45 = vpack.c.bf16 %v762_v42, %v761_v41  ;;  %2206 = vmatpush3.bf16.msra.mxu0 %v2205_v30  ;;  %v731_v52 = vld [vmem:[#allocation6 + $0x30] sm:$0xff]  ;;  %v732_v53 = vld [vmem:[#allocation6 + $0x38] sm:$0xff]  ;;  %v749_v56 = vld [vmem:[#allocation6 + $0xc0] sm:$0xff] }
  0x72   : > { %2236 = vmatprep.subr.bf16.mxu1 %v2235_v34  ;;  %v2209_v47 = vpack.c.bf16 %v730_v36, %v729_v35  ;;  %2208 = vmatprep.subr.bf16.mxu0 %v2207_v33  ;;  %v2211_v51 = vpack.c.bf16 %v748_v40, %v747_v37  ;;  %v2863_v55 = vadd.s32 80, %v2823_v1  ;;  %v750_v57 = vld [vmem:[#allocation6 + $0xc8] sm:$0xff]  ;;  %v2243_v58 = vpack.c.bf16 %v764_v49, %v763_v48  ;;  %v765_v61 = vld [vmem:[#allocation6 + $0x140] sm:$0xff]  ;;  %v751_v11 = vld [vmem:[#allocation6 + $0xd0] sm:$0xff]  ;;  %s2593_s22 = smov [#allocation9]  }
  0x73   : > { %v360_v46 = vand.u32 15, %v2851_v39  ;;  %v367_v50 = vand.u32 15, %v2854_v43  ;;  %v374_v54 = vand.u32 15, %v2857_v44  ;;  %2238 = vmatpush3.bf16.msra.mxu1 %v2235_v34  ;;  %v2213_v60 = vpack.c.bf16 %v732_v53, %v731_v52  ;;  %v766_v62 = vld [vmem:[#allocation6 + $0x148] sm:$0xff]  ;;  %v733_v9 = vld [vmem:[#allocation6 + $0x40] sm:$0xff]  ;;  %v752_v14 = vld [vmem:[#allocation6 + $0xd8] sm:$0xff] }
  0x74   : > { %2240 = vmatprep.subr.bf16.mxu1 %v2239_v45  ;;  %v381_v59 = vand.u32 15, %v2863_v55  ;;  %v2867_v63 = vadd.s32 88, %v2823_v1  ;;  %v2215_v0 = vpack.c.bf16 %v750_v57, %v749_v56  ;;  %v734_v10 = vld [vmem:[#allocation6 + $0x48] sm:$0xff]  ;;  %v2247_v15 = vpack.c.bf16 %v766_v62, %v765_v61  ;;  %v2870_v16 = vld [vmem:[%s2813_s12] sm:$0xff]  ;;  %v767_v21 = vld [vmem:[#allocation6 + $0x150] sm:$0xff]  ;;  %s2520_s6 = sshll.u32 %s2593_s22, 4  ;;  %s2521_s6 = int_to_ptr.vmem [resolvable:$false] %s2520_s6 }
  0x75   : > { %2210 = vmatpush3.bf16.msra.mxu0 %v2209_v47  ;;  %v2217_v20 = vpack.c.bf16 %v734_v10, %v733_v9  ;;  %v768_v22 = vld [vmem:[#allocation6 + $0x158] sm:$0xff]  ;;  %844 = vmatprep.mubr.f32.mxu0 %v2870_v16  ;;  %v2875_v23 = vld [vmem:[%s2813_s12 + $0x8] sm:$0xff]  ;;  %v612_v24 = vrot.slane %v2870_v16, 1  ;;  %vm3579_vm0 = vcmp.lt.s32.totalorder %v2823_v1, 7  ;;  %v2219_v26 = vpack.c.bf16 %v752_v14, %v751_v11  ;;  %v735_v27 = vld [vmem:[#allocation6 + $0x50] sm:$0xff]  ;;  %s2522_s8 = scalar_lea.vmem %s2521_s6, 4096  ;;  %p2523_p7 = scmp.lt.s32.totalorder %s3524_s13, %s2521_s6 }
  0x76   : > { %2212 = vmatprep.subr.bf16.mxu0 %v2211_v51  ;;  %v388_v17 = vand.u32 15, %v2867_v63  ;;  %v736_v28 = vld [vmem:[#allocation6 + $0x58] sm:$0xff]  ;;  %v613_v29 = vrot.slane %v2875_v23, 1  ;;  %v753_v30 = vld [vmem:[#allocation6 + $0xe0] sm:$0xff]  ;;  %v754_v31 = vld [vmem:[#allocation6 + $0xe8] sm:$0xff]  ;;  %v2251_v32 = vpack.c.bf16 %v768_v22, %v767_v21  ;;  %v2887_v48 = vadd.s32 96, %v2823_v1  ;;  %p2524_p9 = scmp.lt.s32.totalorder %s2522_s8, %s2516_s7 }
  0x77   : > { %2242 = vmatpush3.bf16.msra.mxu1 %v2239_v45  ;;  %v2221_v34 = vpack.c.bf16 %v736_v28, %v735_v27  ;;  %v769_v35 = vld [vmem:[#allocation6 + $0x160] sm:$0xff]  ;;  %v770_v36 = vld [vmem:[#allocation6 + $0x168] sm:$0xff]  ;;  %v2223_v37 = vpack.c.bf16 %v754_v31, %v753_v30  ;;  %v755_v42 = vld [vmem:[#allocation6 + $0xf0] sm:$0xff]  ;;  %v2890_v53 = vadd.s32 104, %v2823_v1  ;;  %v2903_v10 = vadd.s32 112, %v2823_v1 }
  0x78   : > { %2244 = vmatprep.subr.bf16.mxu1 %v2243_v58  ;;  %v643_v33 = vsel %vm3579_vm0, %v612_v24, %v613_v29  ;;  %v737_v40 = vld [vmem:[#allocation6 + $0x60] sm:$0xff]  ;;  %v738_v41 = vld [vmem:[#allocation6 + $0x68] sm:$0xff]  ;;  %v756_v45 = vld [vmem:[#allocation6 + $0xf8] sm:$0xff]  ;;  %v2255_v47 = vpack.c.bf16 %v770_v36, %v769_v35  ;;  %v395_v9 = vand.u32 15, %v2887_v48  ;;  %v547_v14 = vrot.slane %v2870_v16, 7  ;;  %p2525_p12 = por %p2524_p9, %p2523_p7 }
  0x79   : > { %2214 = vmatpush3.bf16.msra.mxu0 %v2213_v60  ;;  %2119 = vmatprep.mubr.f32.mxu1 %v643_v33  ;;  %v2225_v49 = vpack.c.bf16 %v738_v41, %v737_v40  ;;  %v771_v51 = vld [vmem:[#allocation6 + $0x170] sm:$0xff]  ;;  %v772_v52 = vld [vmem:[#allocation6 + $0x178] sm:$0xff]  ;;  %v2227_v56 = vpack.c.bf16 %v756_v45, %v755_v42  ;;  %vm3581_vm1 = vcmp.lt.s32.totalorder %v2823_v1, 1  ;;  %v2910_v21 = vadd.s32 120, %v2823_v1  ;;  %v2915_v27 = vld [vmem:[%s2813_s12 + $0x20] sm:$0xff] }
  0x7a   : > { %2216 = vmatprep.subr.bf16.mxu0 %v2215_v0  ;;  %v739_v57 = vld [vmem:[#allocation6 + $0x70] sm:$0xff]  ;;  %v2893_v60 = vld [vmem:[%s2813_s12 + $0x78] sm:$0xff]  ;;  %v2259_v61 = vpack.c.bf16 %v772_v52, %v771_v51  ;;  %v2918_v28 = vld [vmem:[%s2813_s12 + $0x28] sm:$0xff]  ;;  %v409_v30 = vand.u32 15, %v2903_v10  ;;  %vm2927_vm2 = vcmp.ne.s32.totalorder %v311_v2, 0  ;;  %vm2939_vm3 = vcmp.ne.s32.totalorder %v318_v8, 15  ;;  %p2526_p1 = pnand %p2525_p12, %p2519_p3 }
  0x7b   : > { %2246 = vmatpush3.bf16.msra.mxu1 %v2243_v58  ;;  %v740_v58 = vld [vmem:[#allocation6 + $0x78] sm:$0xff]  ;;  %v2896_v62 = vld [vmem:[%s2813_s12 + $0x10] sm:$0xff]  ;;  %v1310_v31 = vld [vmem:[#allocation8 + $0x100] sm:$0xff]  ;;  %v416_v40 = vand.u32 15, %v2910_v21  ;;  %v616_v45 = vrot.slane %v2915_v27, 1  ;;  %vm2965_vm4 = vcmp.ne.s32.totalorder %v332_v18, 15 }
  0x7c   : > { %2248 = vmatprep.subr.bf16.mxu1 %v2247_v15  ;;  %v2899_v0 = vld [vmem:[%s2813_s12 + $0x18] sm:$0xff]  ;;  %v2229_v11 = vpack.c.bf16 %v740_v58, %v739_v57  ;;  %v614_v22 = vrot.slane %v2896_v62, 1  ;;  %v1311_v35 = vld [vmem:[#allocation8 + $0x108] sm:$0xff]  ;;  %v1312_v36 = vld [vmem:[#allocation8 + $0x110] sm:$0xff]  ;;  %v549_v8 = vrot.slane %v2896_v62, 7  ;;  %vm2981_vm5 = vcmp.ne.s32.totalorder %v325_v12, 0 }
  0x7d   : > { %2218 = vmatpush3.bf16.msra.mxu0 %v2217_v20  ;;  %v402_v20 = vand.u32 15, %v2890_v53  ;;  %v2295_v51 = vpack.c.bf16 %v1311_v35, %v1310_v31  ;;  %v2957_v52 = vld [vmem:[%s2813_s12 + $0x38] sm:$0xff]  ;;  %v1315_v57 = vld [vmem:[#allocation8 + $0x128] sm:$0xff]  ;;  %v550_v31 = vrot.slane %v2899_v0, 7  ;;  %vm2995_vm6 = vcmp.ne.s32.totalorder %v346_v25, 15  ;;  %v1318_v10 = vld [vmem:[#allocation8 + $0x140] sm:$0xff] }
  0x7e   : > { %2220 = vmatprep.subr.bf16.mxu0 %v2219_v26  ;;  %v615_v26 = vrot.slane %v2899_v0, 1  ;;  %v642_v41 = vsel %vm3579_vm0, %v613_v29, %v614_v22  ;;  %v551_v25 = vrot.slane %v2915_v27, 7  ;;  %vm3021_vm7 = vcmp.ne.s32.totalorder %v360_v46, 15 }
  0x7f   : > { %2250 = vmatpush3.bf16.msra.mxu1 %v2247_v15  ;;  %v562_v15 = vrot.slane %v2893_v60, 7  ;;  %v576_v7 = vsel %vm3581_vm1, %v549_v8, %v550_v31  ;;  %vm3037_vm8 = vcmp.ne.s32.totalorder %v339_v19, 0  ;;  %vm3051_vm9 = vcmp.ne.s32.totalorder %v374_v54, 15 }
  0x80   : > { %2252 = vmatprep.subr.bf16.mxu1 %v2251_v32  ;;  %v641_v42 = vsel %vm3579_vm0, %v614_v22, %v615_v26  ;;  %v640_v58 = vsel %vm3579_vm0, %v615_v26, %v616_v45  ;;  %v2974_v22 = vld [vmem:[%s2813_s12 + $0x40] sm:$0xff]  ;;  %v575_v39 = vsel %vm3581_vm1, %v550_v31, %v551_v25  ;;  %vm3074_vm10 = vcmp.ne.s32.totalorder %v388_v17, 15 }
  0x81   : > { %2222 = vmatpush3.bf16.msra.mxu0 %v2221_v34  ;;  %v548_v34 = vrot.slane %v2875_v23, 7  ;;  %v620_v12 = vrot.slane %v2974_v22, 1  ;;  %vm3087_vm11 = vcmp.ne.s32.totalorder %v353_v38, 0  ;;  %v554_v17 = vrot.slane %v2957_v52, 7 }
  0x82   : > { %2224 = vmatprep.subr.bf16.mxu0 %v2223_v37  ;;  %v1313_v37 = vld [vmem:[#allocation8 + $0x118] sm:$0xff]  ;;  %vm3098_vm12 = vcmp.ne.s32.totalorder %v402_v20, 15  ;;  %v555_v31 = vrot.slane %v2974_v22, 7  ;;  %vm3118_vm13 = vcmp.ne.s32.totalorder %v416_v40, 15  ;;  %vm3127_vm14 = vcmp.ne.s32.totalorder %v367_v50, 0 }
  0x83   : > { %2254 = vmatpush3.bf16.msra.mxu1 %v2251_v32  ;;  %v579_v32 = vsel %vm3581_vm1, %v562_v15, %v547_v14  ;;  %v2299_v29 = vpack.c.bf16 %v1313_v37, %v1312_v36  ;;  %v578_v3 = vsel %vm3581_vm1, %v547_v14, %v548_v34  ;;  %v619_v14 = vrot.slane %v2957_v52, 1  ;;  %v3006_v36 = vld [vmem:[%s2813_s12 + $0x50] sm:$0xff]  ;;  %v3013_v37 = vld [vmem:[%s2813_s12 + $0x58] sm:$0xff] }
  0x84   : > { %2256 = vmatprep.subr.bf16.mxu1 %v2255_v47  ;;  %v577_v5 = vsel %vm3581_vm1, %v548_v34, %v549_v8  ;;  %v557_v21 = vrot.slane %v3006_v36, 7  ;;  %vm3145_vm15 = vcmp.ne.s32.totalorder %v381_v59, 0  ;;  %v3619_v50 = vmov 0 }
  0x85   : > { %2226 = vmatpush3.bf16.msra.mxu0 %v2225_v49  ;;  %v2950_v49 = vld [vmem:[%s2813_s12 + $0x30] sm:$0xff]  ;;  %v3620_v50 = vsel %vm3145_vm15, 4294967295, %v3619_v50  ;;  %v558_v40 = vrot.slane %v3013_v37, 7 }
  0x86   : > { %2228 = vmatprep.subr.bf16.mxu0 %v2227_v56  ;;  %v1314_v56 = vld [vmem:[#allocation8 + $0x120] sm:$0xff]  ;;  %v553_v54 = vrot.slane %v2950_v49, 7 }
  0x87   : > { %2258 = vmatpush3.bf16.msra.mxu1 %v2255_v47  ;;  %v617_v47 = vrot.slane %v2918_v28, 1  ;;  %v2303_v26 = vpack.c.bf16 %v1315_v57, %v1314_v56  ;;  %v3062_v57 = vld [vmem:[%s2813_s12 + $0x70] sm:$0xff] }
  0x88   : > { %2260 = vmatprep.subr.bf16.mxu1 %v2259_v61  ;;  %v572_v38 = vsel %vm3581_vm1, %v553_v54, %v554_v17 }
  0x89   : > { %2230 = vmatpush3.bf16.msra.mxu0 %v2229_v11  ;;  %v639_v11 = vsel %vm3579_vm0, %v616_v45, %v617_v47 }
  0x8a   : > { %2296 = vmatprep.subr.bf16.mxu0 %v2295_v51 }
  0x8b   : > { %2262 = vmatpush3.bf16.msra.mxu1 %v2259_v61  ;;  %v618_v61 = vrot.slane %v2950_v49, 1 }
  0x8c   : > { %1800 = vmatmul.mubr.msk.f32.vlgmr.msra.gmra.mrb[0].mxu0 %vm2927_vm2, %v579_v32  ;;  %v2987_v32 = vld [vmem:[%s2813_s12 + $0x48] sm:$0xff] }
  0x8d   : > { %849 = vmatprep.mubr.f32.mxu0 %v2875_v23  ;;  %2298 = vmatpush3.bf16.msra.mxu0 %v2295_v51  ;;  %v637_v34 = vsel %vm3579_vm0, %v618_v61, %v619_v14  ;;  %v621_v35 = vrot.slane %v2987_v32, 1  ;;  %v3030_v51 = vld [vmem:[%s2813_s12 + $0x60] sm:$0xff]  ;;  %v556_v16 = vrot.slane %v2987_v32, 7 }
  0x8e   : > { %2120 = vmatmul.mubr.msk.f32.vlgmr.msra.gmra.mrb[0].mxu1 %vm2939_vm3, %v642_v41  ;;  %2300 = vmatprep.subr.bf16.mxu0 %v2299_v29  ;;  %v636_v41 = vsel %vm3579_vm0, %v619_v14, %v620_v12  ;;  %v624_v6 = vrot.slane %v3030_v51, 1  ;;  %v627_v14 = vrot.slane %v2893_v60, 1 }
  0x8f   : > { %2122 = vmatprep.mubr.f32.mxu1 %v641_v42  ;;  %v635_v45 = vsel %vm3579_vm0, %v620_v12, %v621_v35  ;;  %v569_v43 = vsel %vm3581_vm1, %v556_v16, %v557_v21 }
  0x90   : > { %850 = vmatmul.mubr.f32.gmra.mrb[2].mxu0 %v578_v3  ;;  %v3043_v3 = vld [vmem:[%s2813_s12 + $0x68] sm:$0xff]  ;;  %v644_v53 = vsel %vm3579_vm0, %v627_v14, %v612_v24  ;;  %v570_v24 = vsel %vm3581_vm1, %v555_v31, %v556_v16  ;;  %v1301_v16 = vld [vmem:[#allocation8 + $0xb8] sm:$0xff] }
  0x91   : > { %854 = vmatprep.mubr.f32.mxu0 %v2896_v62  ;;  %v638_v62 = vsel %vm3579_vm0, %v617_v47, %v618_v61  ;;  %2302 = vmatpush3.bf16.msra.mxu0 %v2299_v29  ;;  %v623_v47 = vrot.slane %v3013_v37, 1  ;;  %v552_v29 = vrot.slane %v2918_v28, 7  ;;  %v625_v56 = vrot.slane %v3043_v3, 1 }
  0x92   : > { %2123 = vmatmul.mubr.msk.f32.gmra.mrb[2].mxu1 %vm2965_vm4, %v640_v58  ;;  %2304 = vmatprep.subr.bf16.mxu0 %v2303_v26  ;;  %v560_v12 = vrot.slane %v3043_v3, 7 }
  0x93   : > { %2125 = vmatprep.mubr.f32.mxu1 %v639_v11  ;;  %v574_v44 = vsel %vm3581_vm1, %v551_v25, %v552_v29  ;;  %v632_v58 = vsel %vm3579_vm0, %v623_v47, %v624_v6  ;;  %v631_v11 = vsel %vm3579_vm0, %v624_v6, %v625_v56  ;;  %v1317_v25 = vld [vmem:[#allocation8 + $0x138] sm:$0xff]  ;;  %v1295_v6 = vld [vmem:[#allocation8 + $0x88] sm:$0xff] }
  0x94   : > { %1802 = vmatmul.mubr.msk.f32.gmra.mrb[4].mxu0 %vm2981_vm5, %v577_v5 }
  0x95   : > { %859 = vmatprep.mubr.f32.mxu0 %v2899_v0  ;;  %v622_v0 = vrot.slane %v3006_v36, 1  ;;  %2306 = vmatpush3.bf16.msra.mxu0 %v2303_v26  ;;  %v573_v26 = vsel %vm3581_vm1, %v552_v29, %v553_v54  ;;  %v1325_v29 = vld [vmem:[#allocation8 + $0x178] sm:$0xff]  ;;  %v1296_v54 = vld [vmem:[#allocation8 + $0x90] sm:$0xff] }
  0x96   : > { %2126 = vmatmul.mubr.msk.f32.gmra.mrb[4].mxu1 %vm2995_vm6, %v638_v62 }
  0x97   : > { %2128 = vmatprep.mubr.f32.mxu1 %v637_v34  ;;  %v633_v19 = vsel %vm3579_vm0, %v622_v0, %v623_v47 }
  0x98   : > { %860 = vmatmul.mubr.f32.gmra.mrb[6].mxu0 %v576_v7  ;;  %v1316_v7 = vld [vmem:[#allocation8 + $0x130] sm:$0xff] }
  0x99   : > { %864 = vmatprep.mubr.f32.mxu0 %v2915_v27  ;;  %v634_v27 = vsel %vm3579_vm0, %v621_v35, %v622_v0  ;;  %v561_v35 = vrot.slane %v3062_v57, 7  ;;  %v1320_v0 = vld [vmem:[#allocation8 + $0x150] sm:$0xff] }
  0x9a   : > { %2129 = vmatmul.mubr.msk.f32.gmra.mrb[6].mxu1 %vm3021_vm7, %v636_v41 }
  0x9b   : > { %2131 = vmatprep.mubr.f32.mxu1 %v635_v45  ;;  %v565_v48 = vsel %vm3581_vm1, %v560_v12, %v561_v35  ;;  %v1321_v45 = vld [vmem:[#allocation8 + $0x158] sm:$0xff] }
  0x9c   : > { %1804 = vmatmul.mubr.msk.f32.gmra.mrb[8].mxu0 %vm3037_vm8, %v575_v39  ;;  %v2315_v47 = vpack.c.bf16 %v1321_v45, %v1320_v0  ;;  %v1290_v45 = vld [vmem:[#allocation8 + $0x60] sm:$0xff] }
  0x9d   : > { %869 = vmatprep.mubr.f32.mxu0 %v2918_v28  ;;  %v626_v28 = vrot.slane %v3062_v57, 1 }
  0x9e   : > { %2132 = vmatmul.mubr.msk.f32.gmra.mrb[8].mxu1 %vm3051_vm9, %v634_v27  ;;  %v1294_v27 = vld [vmem:[#allocation8 + $0x80] sm:$0xff] }
  0x9f   : > { %2134 = vmatprep.mubr.f32.mxu1 %v633_v19  ;;  %v630_v5 = vsel %vm3579_vm0, %v625_v56, %v626_v28  ;;  %v629_v13 = vsel %vm3579_vm0, %v626_v28, %v627_v14  ;;  %vm3161_vm0 = vcmp.ne.s32.totalorder %v395_v9, 0  ;;  %v3623_v9 = vmov 0  ;;  %v1278_v56 = vld [vmem:[#allocation8] sm:$0xff]  ;;  %v1281_v14 = vld [vmem:[#allocation8 + $0x18] sm:$0xff] }
  0xa0   : > { %870 = vmatmul.mubr.f32.gmra.mrb[10].mxu0 %v574_v44  ;;  %v2263_v19 = vpack.c.bf16 %v1295_v6, %v1294_v27 }
  0xa1   : > { %874 = vmatprep.mubr.f32.mxu0 %v2950_v49 }
  0xa2   : > { %2135 = vmatmul.mubr.msk.f32.gmra.mrb[10].mxu1 %vm3074_vm10, %v632_v58  ;;  %2264 = vmatprep.subr.bf16.mxu1 %v2263_v19  ;;  %v1297_v58 = vld [vmem:[#allocation8 + $0x98] sm:$0xff] }
  0xa3   : > { %2137 = vmatprep.mubr.f32.mxu1 %v631_v11  ;;  %v2267_v28 = vpack.c.bf16 %v1297_v58, %v1296_v54  ;;  %v1280_v11 = vld [vmem:[#allocation8 + $0x10] sm:$0xff] }
  0xa4   : > { %1806 = vmatmul.mubr.msk.f32.gmra.mrb[12].mxu0 %vm3087_vm11, %v573_v26  ;;  %v2269_v26 = vpack.c.bf16 %v1281_v14, %v1280_v11 }
  0xa5   : > { %879 = vmatprep.mubr.f32.mxu0 %v2957_v52  ;;  %v571_v52 = vsel %vm3581_vm1, %v554_v17, %v555_v31  ;;  %v1298_v17 = vld [vmem:[#allocation8 + $0xa0] sm:$0xff]  ;;  %v1283_v31 = vld [vmem:[#allocation8 + $0x28] sm:$0xff] }
  0xa6   : > { %2138 = vmatmul.mubr.msk.f32.gmra.mrb[12].mxu1 %vm3098_vm12, %v630_v5  ;;  %v1299_v5 = vld [vmem:[#allocation8 + $0xa8] sm:$0xff] }
  0xa7   : > { %2140 = vmatprep.mubr.f32.mxu1 %v629_v13  ;;  %v2271_v13 = vpack.c.bf16 %v1299_v5, %v1298_v17 }
  0xa8   : > { %880 = vmatmul.mubr.f32.gmra.mrb[14].mxu0 %v572_v38  ;;  %v1282_v38 = vld [vmem:[#allocation8 + $0x20] sm:$0xff] }
  0xa9   : > { %884 = vmatprep.mubr.f32.mxu0 %v2974_v22  ;;  %v568_v22 = vsel %vm3581_vm1, %v557_v21, %v558_v40  ;;  %v1284_v21 = vld [vmem:[#allocation8 + $0x30] sm:$0xff] }
  0xaa   : > { %2141 = vmatmul.mubr.msk.f32.gmra.mrb[14].mxu1 %vm3118_vm13, %v644_v53  ;;  %v2273_v53 = vpack.c.bf16 %v1283_v31, %v1282_v38 }
  0xac   : > { %1808 = vmatmul.mubr.msk.f32.gmra.mrb[16].mxu0 %vm3127_vm14, %v571_v52  ;;  %v1300_v52 = vld [vmem:[#allocation8 + $0xb0] sm:$0xff] }
  0xad   : > { %889 = vmatprep.mubr.f32.mxu0 %v2987_v32  ;;  %v559_v32 = vrot.slane %v3030_v51, 7 }
  0xaf   : > { %v567_v55 = vsel %vm3581_vm1, %v558_v40, %v559_v32  ;;  %v566_v34 = vsel %vm3581_vm1, %v559_v32, %v560_v12  ;;  %v1303_v32 = vld [vmem:[#allocation8 + $0xc8] sm:$0xff]  ;;  %v1286_v12 = vld [vmem:[#allocation8 + $0x40] sm:$0xff] }
  0xb0   : > { %890 = vmatmul.mubr.f32.gmra.mrb[18].mxu0 %v570_v24  ;;  %v2275_v24 = vpack.c.bf16 %v1301_v16, %v1300_v52 }
  0xb1   : > { %894 = vmatprep.mubr.f32.mxu0 %v3006_v36  ;;  %v564_v36 = vsel %vm3581_vm1, %v561_v35, %v562_v15  ;;  %v1324_v15 = vld [vmem:[#allocation8 + $0x170] sm:$0xff]  ;;  %vm3625_vm1 = vcmp.lt.s32.totalorder %v2823_v1, 7 }
  0xb4   : > { %1810 = vmatmul.mubr.msk.f32.gmra.mrb[20].mxu0 %vm3145_vm15, %v569_v43  ;;  %vm3177_vm15 = vcmp.ne.s32.totalorder %v409_v30, 0  ;;  %v1319_v30 = vld [vmem:[#allocation8 + $0x148] sm:$0xff]  ;;  %v1285_v43 = vld [vmem:[#allocation8 + $0x38] sm:$0xff] }
  0xb5   : > { %899 = vmatprep.mubr.f32.mxu0 %v3013_v37  ;;  %v3624_v9 = vsel %vm3177_vm15, 4294967295, %v3623_v9  ;;  %v2307_v37 = vpack.c.bf16 %v1317_v25, %v1316_v7  ;;  %v2311_v41 = vpack.c.bf16 %v1319_v30, %v1318_v10  ;;  %v2277_v40 = vpack.c.bf16 %v1285_v43, %v1284_v21  ;;  %v1288_v25 = vld [vmem:[#allocation8 + $0x50] sm:$0xff]  ;;  %v1306_v30 = vld [vmem:[#allocation8 + $0xe0] sm:$0xff] }
  0xb7   : > { %2308 = vmatprep.subr.bf16.mxu0 %v2307_v37 }
  0xb8   : > { %900 = vmatmul.mubr.f32.gmra.mrb[22].mxu0 %v568_v22  ;;  %v1302_v22 = vld [vmem:[#allocation8 + $0xc0] sm:$0xff] }
  0xb9   : > { %904 = vmatprep.mubr.f32.mxu0 %v3030_v51  ;;  %2310 = vmatpush3.bf16.msra.mxu0 %v2307_v37  ;;  %v1323_v51 = vld [vmem:[#allocation8 + $0x168] sm:$0xff]  ;;  %v1289_v37 = vld [vmem:[#allocation8 + $0x58] sm:$0xff] }
  0xba   : > { %2312 = vmatprep.subr.bf16.mxu0 %v2311_v41  ;;  %v2285_v10 = vpack.c.bf16 %v1289_v37, %v1288_v25 }
  0xbc   : > { %1812 = vmatmul.mubr.msk.f32.gmra.mrb[24].mxu0 %vm3161_vm0, %v567_v55  ;;  %v2279_v55 = vpack.c.bf16 %v1303_v32, %v1302_v22 }
  0xbd   : > { %909 = vmatprep.mubr.f32.mxu0 %v3043_v3  ;;  %2314 = vmatpush3.bf16.msra.mxu0 %v2311_v41  ;;  %v2323_v3 = vpack.c.bf16 %v1325_v29, %v1324_v15  ;;  %v1307_v41 = vld [vmem:[#allocation8 + $0xe8] sm:$0xff]  ;;  %v1292_v29 = vld [vmem:[#allocation8 + $0x70] sm:$0xff] }
  0xbe   : > { %2316 = vmatprep.subr.bf16.mxu0 %v2315_v47  ;;  %v2287_v0 = vpack.c.bf16 %v1307_v41, %v1306_v30 }
  0xc0   : > { %910 = vmatmul.mubr.f32.gmra.mrb[26].mxu0 %v566_v34  ;;  %v1287_v34 = vld [vmem:[#allocation8 + $0x48] sm:$0xff] }
  0xc1   : > { %914 = vmatprep.mubr.f32.mxu0 %v3062_v57  ;;  %2318 = vmatpush3.bf16.msra.mxu0 %v2315_v47  ;;  %v1279_v57 = vld [vmem:[#allocation8 + $0x8] sm:$0xff]  ;;  %v2281_v35 = vpack.c.bf16 %v1287_v34, %v1286_v12 }
  0xc2   : > { %v2265_v44 = vpack.c.bf16 %v1279_v57, %v1278_v56  ;;  %v1291_v47 = vld [vmem:[#allocation8 + $0x68] sm:$0xff]  ;;  %v3191_v56 = vld [vmem:[%s3572_s2] ss:$0 sm:$0xff] }
  0xc4   : > { %1814 = vmatmul.mubr.msk.f32.gmra.mrb[28].mxu0 %vm3177_vm15, %v565_v48  ;;  %2266 = vmatpush3.bf16.msra.mxu1 %v2265_v44  ;;  %v1304_v48 = vld [vmem:[#allocation8 + $0xd0] sm:$0xff]  ;;  %vm3626_vm15 = vcmp.lt.s32.totalorder %v2823_v1, 1 }
  0xc5   : > { %919 = vmatprep.mubr.f32.mxu0 %v2893_v60  ;;  %v1322_v60 = vld [vmem:[#allocation8 + $0x160] sm:$0xff]  ;;  %2268 = vmatprep.subr.bf16.mxu1 %v2267_v28 }
  0xc6   : > { %v2319_v39 = vpack.c.bf16 %v1323_v51, %v1322_v60  ;;  %v2289_v60 = vpack.c.bf16 %v1291_v47, %v1290_v45  ;;  %v1308_v51 = vld [vmem:[#allocation8 + $0xf0] sm:$0xff] }
  0xc8   : > { %920 = vmatmul.mubr.f32.gmra.mrb[30].mxu0 %v564_v36  ;;  %2320 = vmatprep.subr.bf16.mxu0 %v2319_v39  ;;  %v1305_v36 = vld [vmem:[#allocation8 + $0xd8] sm:$0xff] }
  0xc9   : > { %2322 = vmatpush3.bf16.msra.mxu0 %v2319_v39  ;;  %2270 = vmatpush3.bf16.msra.mxu1 %v2269_v26  ;;  %v2283_v7 = vpack.c.bf16 %v1305_v36, %v1304_v48  ;;  %v1309_v39 = vld [vmem:[#allocation8 + $0xf8] sm:$0xff] }
  0xca   : > { %2324 = vmatprep.subr.bf16.mxu0 %v2323_v3  ;;  %2272 = vmatprep.subr.bf16.mxu1 %v2271_v13  ;;  %v2291_v15 = vpack.c.bf16 %v1309_v39, %v1308_v51 }
  0xcd   : > { %2326 = vmatpush3.bf16.msra.mxu0 %v2323_v3  ;;  %2274 = vmatpush3.bf16.msra.mxu1 %v2273_v53  ;;  %v1293_v3 = vld [vmem:[#allocation8 + $0x78] sm:$0xff] }
  0xce   : > { %2276 = vmatprep.subr.bf16.mxu1 %v2275_v24  ;;  %v2293_v27 = vpack.c.bf16 %v1293_v3, %v1292_v29 }
  0xd1   : > { %2278 = vmatpush3.bf16.msra.mxu1 %v2277_v40 }
  0xd2   : > { %2280 = vmatprep.subr.bf16.mxu1 %v2279_v55 }
  0xd5   : > { %2282 = vmatpush3.bf16.msra.mxu1 %v2281_v35 }
  0xd6   : > { %2284 = vmatprep.subr.bf16.mxu1 %v2283_v7 }
  0xd9   : > { %2286 = vmatpush3.bf16.msra.mxu1 %v2285_v10 }
  0xda   : > { %2288 = vmatprep.subr.bf16.mxu1 %v2287_v0 }
  0xdd   : > { %2290 = vmatpush3.bf16.msra.mxu1 %v2289_v60 }
  0xde   : > { %2292 = vmatprep.subr.bf16.mxu1 %v2291_v15 }
  0xe1   : > { %2294 = vmatpush3.bf16.msra.mxu1 %v2293_v27 }
 0x15f   : > { %v1895_v6 = vpop.f32.mrb[0].mxu0 }
 0x160   : > { %v1896_v19 = vpop.f32.mrb[1].mxu0 }
 0x161   : > { %v1897_v57 = vadd.f32 %v1896_v19, %v1895_v6  ;;  %v2121_v44 = vpop.f32.mrb[0].mxu1 }
 0x162   : > { %v991_v54 = vpop.f32.mrb[1].mxu1 }
 0x163   : > { %v1898_v58 = vpop.f32.mrb[2].mxu0  ;;  %v847_v28 = vadd.f32 %v1897_v57, %v3191_v56 }
 0x164   : > { %v1899_v11 = vpop.f32.mrb[3].mxu0 }
 0x165   : > { %v1900_v14 = vadd.f32 %v1899_v11, %v1898_v58  ;;  %v992_v26 = vadd.f32 %v991_v54, %v847_v28  ;;  %v2124_v17 = vpop.f32.mrb[2].mxu1 }
 0x166   : > { %v1001_v5 = vpop.f32.mrb[3].mxu1 }
 0x167   : > { %v852_v13 = vadd.f32 %v1900_v14, %v3191_v56  ;;  %v3195_v38 = vmax.f32 %v992_v26, 0.0  ;;  %v1901_v31 = vpop.f32.mrb[4].mxu0 }
 0x168   : > { %v1902_v53 = vpop.f32.mrb[5].mxu0 }
 0x169   : > { %v997_v52 = vadd.f32 %v2121_v44, %v852_v13  ;;  %v1903_v16 = vadd.f32 %v1902_v53, %v1901_v31  ;;  %1397 = vmatprep.mubr.f32.mxu1 %v3195_v38  ;;  %v2127_v24 = vpop.f32.mrb[4].mxu1  ;;  %v1102_v32 = vrot.slane %v3195_v38, 7  ;;  %v1166_v55 = vrot.slane %v3195_v38, 1 }
 0x16a   : > { %v1011_v21 = vpop.f32.mrb[5].mxu1 }
 0x16b   : > { %v3198_v43 = vmax.f32 %v997_v52, 0.0  ;;  %v1904_v40 = vpop.f32.mrb[6].mxu0  ;;  %v857_v22 = vadd.f32 %v1903_v16, %v3191_v56 }
 0x16c   : > { %v1905_v12 = vpop.f32.mrb[7].mxu0 }
 0x16d   : > { %v1906_v34 = vadd.f32 %v1905_v12, %v1904_v40  ;;  %v1002_v35 = vadd.f32 %v1001_v5, %v857_v22  ;;  %v1167_v48 = vrot.slane %v3198_v43, 1  ;;  %v2130_v36 = vpop.f32.mrb[6].mxu1  ;;  %v1103_v7 = vrot.slane %v3198_v43, 7 }
 0x16e   : > { %v1021_v25 = vpop.f32.mrb[7].mxu1 }
 0x16f   : > { %v862_v37 = vadd.f32 %v1906_v34, %v3191_v56  ;;  %v3206_v10 = vmax.f32 %v1002_v35, 0.0  ;;  %v1907_v30 = vpop.f32.mrb[8].mxu0  ;;  %v1196_v41 = vsel %vm3625_vm1, %v1166_v55, %v1167_v48  ;;  %v3216_v0 = vsel %vm3626_vm15, %v1102_v32, %v1103_v7 }
 0x170   : > { %v1908_v45 = vpop.f32.mrb[9].mxu0  ;;  %2175 = vmatprep.mubr.f32.mxu0 %v1196_v41 }
 0x171   : > { %v1007_v47 = vadd.f32 %v2124_v17, %v862_v37  ;;  %v1104_v60 = vrot.slane %v3206_v10, 7  ;;  %v1168_v51 = vrot.slane %v3206_v10, 1  ;;  %v1909_v39 = vadd.f32 %v1908_v45, %v1907_v30  ;;  %v3220_v15 = vpop.f32.mrb[8].mxu1 }
 0x172   : > { %v1031_v29 = vpop.f32.mrb[9].mxu1 }
 0x173   : > { %v3222_v3 = vmax.f32 %v1007_v47, 0.0  ;;  %v1910_v27 = vpop.f32.mrb[10].mxu0  ;;  %v867_v6 = vadd.f32 %v1909_v39, %v3191_v56  ;;  %v1195_v19 = vsel %vm3625_vm1, %v1167_v48, %v1168_v51  ;;  %v3229_v57 = vsel %vm3626_vm15, %v1103_v7, %v1104_v60 }
 0x174   : > { %v1911_v44 = vpop.f32.mrb[11].mxu0  ;;  %2176 = vmatmul.mubr.msk.f32.vlgmr.msra.gmra.mrb[32].mxu0 %vm2939_vm3, %v1195_v19  ;;  %vm3627_vm3 = vmmov %vm3626_vm15 }
 0x175   : > { %v1912_v54 = vadd.f32 %v1911_v44, %v1910_v27  ;;  %v1012_v58 = vadd.f32 %v1011_v21, %v867_v6  ;;  %v1169_v28 = vrot.slane %v3222_v3, 1  ;;  %v3234_v11 = vpop.f32.mrb[10].mxu1  ;;  %v1105_v14 = vrot.slane %v3222_v3, 7  ;;  %vm3628_vm15 = vmmov %vm3625_vm1 }
 0x176   : > { %v3237_v26 = vpop.f32.mrb[11].mxu1 }
 0x177   : > { %v872_v17 = vadd.f32 %v1912_v54, %v3191_v56  ;;  %v3240_v5 = vmax.f32 %v1012_v58, 0.0  ;;  %v1913_v13 = vpop.f32.mrb[12].mxu0  ;;  %v1194_v31 = vsel %vm3625_vm1, %v1168_v51, %v1169_v28  ;;  %v3246_v2 = vsel %vm3627_vm3, %v1104_v60, %v1105_v14  ;;  %vm3629_vm1 = vmmov %vm3627_vm3 }
 0x178   : > { %v1914_v53 = vpop.f32.mrb[13].mxu0  ;;  %2178 = vmatprep.mubr.f32.mxu0 %v1194_v31  ;;  %vm3630_vm3 = vmmov %vm3628_vm15 }
 0x179   : > { %v1017_v52 = vadd.f32 %v2127_v24, %v872_v17  ;;  %v1106_v16 = vrot.slane %v3240_v5, 7  ;;  %v1170_v21 = vrot.slane %v3240_v5, 1  ;;  %v1915_v40 = vadd.f32 %v1914_v53, %v1913_v13  ;;  %v3250_v22 = vpop.f32.mrb[12].mxu1 }
 0x17a   : > { %v3252_v12 = vpop.f32.mrb[13].mxu1 }
 0x17b   : > { %v3254_v34 = vmax.f32 %v1017_v52, 0.0  ;;  %v1916_v35 = vpop.f32.mrb[14].mxu0  ;;  %v877_v48 = vadd.f32 %v1915_v40, %v3191_v56  ;;  %v1193_v7 = vsel %vm3628_vm15, %v1169_v28, %v1170_v21  ;;  %v3261_v24 = vsel %vm3629_vm1, %v1105_v14, %v1106_v16  ;;  %vm3632_vm15 = vmmov %vm3630_vm3 }
 0x17c   : > { %v1917_v37 = vpop.f32.mrb[15].mxu0  ;;  %2179 = vmatmul.mubr.msk.f32.gmra.mrb[34].mxu0 %vm2965_vm4, %v1193_v7  ;;  %vm3631_vm4 = vmmov %vm3629_vm1 }
 0x17d   : > { %v1918_v30 = vadd.f32 %v1917_v37, %v1916_v35  ;;  %v1022_v41 = vadd.f32 %v1021_v25, %v877_v48  ;;  %v1171_v45 = vrot.slane %v3254_v34, 1  ;;  %v3266_v47 = vpop.f32.mrb[14].mxu1  ;;  %v1107_v60 = vrot.slane %v3254_v34, 7 }
 0x17e   : > { %v3269_v51 = vpop.f32.mrb[15].mxu1 }
 0x17f   : > { %v882_v39 = vadd.f32 %v1918_v30, %v3191_v56  ;;  %v3272_v27 = vmax.f32 %v1022_v41, 0.0  ;;  %v1919_v6 = vpop.f32.mrb[16].mxu0  ;;  %v1192_v19 = vsel %vm3630_vm3, %v1170_v21, %v1171_v45  ;;  %v3278_v23 = vsel %vm3631_vm4, %v1106_v16, %v1107_v60  ;;  %vm3633_vm4 = vmmov %vm3629_vm1 }
 0x180   : > { %v1920_v25 = vpop.f32.mrb[17].mxu0  ;;  %2181 = vmatprep.mubr.f32.mxu0 %v1192_v19 }
 0x181   : > { %v1027_v44 = vadd.f32 %v2130_v36, %v882_v39  ;;  %v1108_v54 = vrot.slane %v3272_v27, 7  ;;  %v1172_v58 = vrot.slane %v3272_v27, 1  ;;  %v1921_v28 = vadd.f32 %v1920_v25, %v1919_v6 }
 0x183   : > { %v3282_v14 = vmax.f32 %v1027_v44, 0.0  ;;  %v1922_v17 = vpop.f32.mrb[18].mxu0  ;;  %v887_v13 = vadd.f32 %v1921_v28, %v3191_v56  ;;  %v1191_v31 = vsel %vm3632_vm15, %v1171_v45, %v1172_v58  ;;  %v3289_v53 = vsel %vm3629_vm1, %v1107_v60, %v1108_v54  ;;  %vm3635_vm15 = vmmov %vm3629_vm1 }
 0x184   : > { %v1923_v52 = vpop.f32.mrb[19].mxu0  ;;  %2182 = vmatmul.mubr.msk.f32.gmra.mrb[36].mxu0 %vm2995_vm6, %v1191_v31  ;;  %vm3634_vm6 = vmmov %vm3630_vm3 }
 0x185   : > { %v1924_v36 = vadd.f32 %v1923_v52, %v1922_v17  ;;  %v1032_v16 = vadd.f32 %v1031_v29, %v887_v13  ;;  %v1173_v21 = vrot.slane %v3282_v14, 1  ;;  %v1109_v40 = vrot.slane %v3282_v14, 7  ;;  %vm3636_vm1 = vmmov %vm3630_vm3 }
 0x187   : > { %v892_v35 = vadd.f32 %v1924_v36, %v3191_v56  ;;  %v3296_v48 = vmax.f32 %v1032_v16, 0.0  ;;  %v1925_v7 = vpop.f32.mrb[20].mxu0  ;;  %v1190_v37 = vsel %vm3630_vm3, %v1172_v58, %v1173_v21  ;;  %v3302_v30 = vsel %vm3633_vm4, %v1108_v54, %v1109_v40  ;;  %vm3637_vm3 = vmmov %vm3633_vm4 }
 0x188   : > { %v1926_v4 = vpop.f32.mrb[21].mxu0  ;;  %2184 = vmatprep.mubr.f32.mxu0 %v1190_v37  ;;  %vm3639_vm4 = vmmov %vm3637_vm3 }
 0x189   : > { %v1037_v29 = vadd.f32 %v3220_v15, %v892_v35  ;;  %v1110_v41 = vrot.slane %v3296_v48, 7  ;;  %v1174_v45 = vrot.slane %v3296_v48, 1  ;;  %v1927_v60 = vadd.f32 %v1926_v4, %v1925_v7 }
 0x18b   : > { %v3307_v39 = vmax.f32 %v1037_v29, 0.0  ;;  %v1928_v6 = vpop.f32.mrb[22].mxu0  ;;  %v897_v19 = vadd.f32 %v1927_v60, %v3191_v56  ;;  %v1189_v25 = vsel %vm3634_vm6, %v1173_v21, %v1174_v45  ;;  %v3314_v44 = vsel %vm3635_vm15, %v1109_v40, %v1110_v41  ;;  %vm3640_vm6 = vmmov %vm3636_vm1 }
 0x18c   : > { %v1929_v54 = vpop.f32.mrb[23].mxu0  ;;  %2185 = vmatmul.mubr.msk.f32.gmra.mrb[38].mxu0 %vm3021_vm7, %v1189_v25  ;;  %vm3638_vm7 = vmmov %vm3636_vm1 }
 0x18d   : > { %v1930_v15 = vadd.f32 %v1929_v54, %v1928_v6  ;;  %v1042_v58 = vadd.f32 %v3237_v26, %v897_v19  ;;  %v1175_v28 = vrot.slane %v3307_v39, 1  ;;  %v1111_v17 = vrot.slane %v3307_v39, 7  ;;  %vm3641_vm15 = vmmov %vm3637_vm3 }
 0x18f   : > { %v902_v13 = vadd.f32 %v1930_v15, %v3191_v56  ;;  %v3322_v31 = vmax.f32 %v1042_v58, 0.0  ;;  %v1931_v52 = vpop.f32.mrb[24].mxu0  ;;  %v1188_v36 = vsel %vm3636_vm1, %v1174_v45, %v1175_v28  ;;  %v3328_v16 = vsel %vm3637_vm3, %v1110_v41, %v1111_v17 }
 0x190   : > { %v1932_v42 = vpop.f32.mrb[25].mxu0  ;;  %2187 = vmatprep.mubr.f32.mxu0 %v1188_v36 }
 0x191   : > { %v1047_v26 = vadd.f32 %v3234_v11, %v902_v13  ;;  %v1112_v21 = vrot.slane %v3322_v31, 7  ;;  %v1176_v40 = vrot.slane %v3322_v31, 1  ;;  %v1933_v35 = vadd.f32 %v1932_v42, %v1931_v52 }
 0x193   : > { %v3333_v7 = vmax.f32 %v1047_v26, 0.0  ;;  %v1934_v37 = vpop.f32.mrb[26].mxu0  ;;  %v907_v4 = vadd.f32 %v1933_v35, %v3191_v56  ;;  %v1187_v29 = vsel %vm3638_vm7, %v1175_v28, %v1176_v40  ;;  %v3340_v41 = vsel %vm3639_vm4, %v1111_v17, %v1112_v21 }
 0x194   : > { %v1935_v45 = vpop.f32.mrb[27].mxu0  ;;  %2188 = vmatmul.mubr.msk.f32.gmra.mrb[40].mxu0 %vm3051_vm9, %v1187_v29  ;;  %vm3642_vm9 = vmmov %vm3636_vm1 }
 0x195   : > { %v1936_v11 = vadd.f32 %v1935_v45, %v1934_v37  ;;  %v1052_v60 = vadd.f32 %v3252_v12, %v907_v4  ;;  %v1177_v6 = vrot.slane %v3333_v7, 1  ;;  %v1113_v19 = vrot.slane %v3333_v7, 7  ;;  %vm3643_vm1 = vmmov %vm3637_vm3 }
 0x196   : > { %vm3644_vm3 = vmmov %vm3640_vm6 }
 0x197   : > { %v912_v25 = vadd.f32 %v1936_v11, %v3191_v56  ;;  %v3348_v54 = vmax.f32 %v1052_v60, 0.0  ;;  %v1937_v15 = vpop.f32.mrb[28].mxu0  ;;  %v1186_v58 = vsel %vm3640_vm6, %v1176_v40, %v1177_v6  ;;  %v1122_v28 = vsel %vm3641_vm15, %v1112_v21, %v1113_v19  ;;  %vm3645_vm7 = vmmov %vm3643_vm1 }
 0x198   : > { %v1938_v8 = vpop.f32.mrb[29].mxu0  ;;  %2190 = vmatprep.mubr.f32.mxu0 %v1186_v58  ;;  %vm3647_vm4 = vmmov %vm3643_vm1 }
 0x199   : > { %v1057_v17 = vadd.f32 %v3250_v22, %v912_v25  ;;  %v1114_v12 = vrot.slane %v3348_v54, 7  ;;  %v1178_v13 = vrot.slane %v3348_v54, 1  ;;  %v1939_v52 = vadd.f32 %v1938_v8, %v1937_v15  ;;  %vm3648_vm6 = vmmov %vm3643_vm1 }
 0x19a   : > { %vm3649_vm15 = vmmov %vm3644_vm3 }
 0x19b   : > { %v1083_v36 = vmax.f32 %v1057_v17, 0.0  ;;  %v1940_v42 = vpop.f32.mrb[30].mxu0  ;;  %v917_v26 = vadd.f32 %v1939_v52, %v3191_v56  ;;  %v1185_v35 = vsel %vm3642_vm9, %v1177_v6, %v1178_v13  ;;  %v1121_v40 = vsel %vm3643_vm1, %v1113_v19, %v1114_v12  ;;  %vm3650_vm9 = vmmov %vm3644_vm3  ;;  %v2415_v52 = vld [vmem:[%s2813_s12 + $0x8] sm:$0xff] }
 0x19c   : > { %v1941_v21 = vpop.f32.mrb[31].mxu0  ;;  %2191 = vmatmul.mubr.msk.f32.gmra.mrb[42].mxu0 %vm3074_vm10, %v1185_v35  ;;  %vm3646_vm10 = vmmov %vm3644_vm3 }
 0x19d   : > { %v1942_v22 = vadd.f32 %v1941_v21, %v1940_v42  ;;  %v1062_v37 = vadd.f32 %v3269_v51, %v917_v26  ;;  %v1179_v4 = vrot.slane %v1083_v36, 1  ;;  %v1115_v29 = vrot.slane %v1083_v36, 7 }
 0x19f   : > { %v922_v45 = vadd.f32 %v1942_v22, %v3191_v56  ;;  %v1084_v11 = vmax.f32 %v1062_v37, 0.0  ;;  %v1184_v60 = vsel %vm3644_vm3, %v1178_v13, %v1179_v4  ;;  %v1120_v6 = vsel %vm3645_vm7, %v1114_v12, %v1115_v29  ;;  %v2416_v37 = vld [vmem:[%s2813_s12 + $0x10] sm:$0xff] }
 0x1a0   : > { %2193 = vmatprep.mubr.f32.mxu0 %v1184_v60 }
 0x1a1   : > { %v1067_v19 = vadd.f32 %v3266_v47, %v922_v45  ;;  %v1116_v25 = vrot.slane %v1084_v11, 7  ;;  %v1180_v61 = vrot.slane %v1084_v11, 1 }
 0x1a3   : > { %v1085_v15 = vmax.f32 %v1067_v19, 0.0  ;;  %v1183_v51 = vsel %vm3646_vm10, %v1179_v4, %v1180_v61  ;;  %v1119_v58 = vsel %vm3647_vm4, %v1115_v29, %v1116_v25 }
 0x1a4   : > { %2194 = vmatmul.mubr.msk.f32.gmra.mrb[44].mxu0 %vm3098_vm12, %v1183_v51 }
 0x1a5   : > { %v1117_v56 = vrot.slane %v1085_v15, 7  ;;  %v1181_v8 = vrot.slane %v1085_v15, 1 }
 0x1a7   : > { %v1133_v17 = vsel %vm3648_vm6, %v1117_v56, %v1102_v32  ;;  %v1182_v47 = vsel %vm3649_vm15, %v1180_v61, %v1181_v8  ;;  %v1197_v12 = vsel %vm3650_vm9, %v1181_v8, %v1166_v55  ;;  %v1118_v13 = vsel %vm3643_vm1, %v1116_v25, %v1117_v56  ;;  %v2417_v25 = vld [vmem:[%s2813_s12 + $0x18] sm:$0xff] }
 0x1a8   : > { %1832 = vmatmul.mubr.msk.f32.vlgmr.msra.gmra.mrb[16].mxu1 %vm2927_vm2, %v1133_v17  ;;  %2196 = vmatprep.mubr.f32.mxu0 %v1182_v47  ;;  %vm3651_vm2 = vnez %v3620_v50  ;;  %v2418_v47 = vld [vmem:[%s2813_s12 + $0x20] sm:$0xff] }
 0x1a9   : > { %1402 = vmatprep.mubr.f32.mxu1 %v3198_v43  ;;  %2197 = vmatmul.mubr.msk.f32.gmra.mrb[46].mxu0 %vm3118_vm13, %v1197_v12 }
 0x1ac   : > { %1403 = vmatmul.mubr.f32.gmra.mrb[18].mxu1 %v3216_v0 }
 0x1ad   : > { %1407 = vmatprep.mubr.f32.mxu1 %v3206_v10  ;;  %v3450_v10 = vld [vmem:[%s3574_s4] ss:$0 sm:$0xff] }
 0x1b0   : > { %1834 = vmatmul.mubr.msk.f32.gmra.mrb[20].mxu1 %vm2981_vm5, %v3229_v57  ;;  %vm3652_vm5 = vnez %v3624_v9 }
 0x1b1   : > { %1412 = vmatprep.mubr.f32.mxu1 %v3222_v3 }
 0x1b4   : > { %1413 = vmatmul.mubr.f32.gmra.mrb[22].mxu1 %v3246_v2 }
 0x1b5   : > { %1417 = vmatprep.mubr.f32.mxu1 %v3240_v5 }
 0x1b8   : > { %1836 = vmatmul.mubr.msk.f32.gmra.mrb[24].mxu1 %vm3037_vm8, %v3261_v24 }
 0x1b9   : > { %1422 = vmatprep.mubr.f32.mxu1 %v3254_v34 }
 0x1bc   : > { %1423 = vmatmul.mubr.f32.gmra.mrb[26].mxu1 %v3278_v23 }
 0x1bd   : > { %1427 = vmatprep.mubr.f32.mxu1 %v3272_v27 }
 0x1c0   : > { %1838 = vmatmul.mubr.msk.f32.gmra.mrb[28].mxu1 %vm3087_vm11, %v3289_v53 }
 0x1c1   : > { %1432 = vmatprep.mubr.f32.mxu1 %v3282_v14 }
 0x1c4   : > { %1433 = vmatmul.mubr.f32.gmra.mrb[30].mxu1 %v3302_v30 }
 0x1c5   : > { %1437 = vmatprep.mubr.f32.mxu1 %v3296_v48 }
 0x1c8   : > { %1840 = vmatmul.mubr.msk.f32.gmra.mrb[32].mxu1 %vm3127_vm14, %v3314_v44 }
 0x1c9   : > { %1442 = vmatprep.mubr.f32.mxu1 %v3307_v39  ;;  %v2414_v39 = vld [vmem:[%s2813_s12] sm:$0xff] }
 0x1cc   : > { %1443 = vmatmul.mubr.f32.gmra.mrb[34].mxu1 %v3328_v16 }
 0x1cd   : > { %1447 = vmatprep.mubr.f32.mxu1 %v3322_v31 }
 0x1d0   : > { %1842 = vmatmul.mubr.msk.f32.gmra.mrb[36].mxu1 %vm3651_vm2, %v3340_v41 }
 0x1d1   : > { %1452 = vmatprep.mubr.f32.mxu1 %v3333_v7 }
 0x1d4   : > { %1453 = vmatmul.mubr.f32.gmra.mrb[38].mxu1 %v1122_v28 }
 0x1d5   : > { %1457 = vmatprep.mubr.f32.mxu1 %v3348_v54 }
 0x1d8   : > { %1844 = vmatmul.mubr.msk.f32.gmra.mrb[40].mxu1 %vm3161_vm0, %v1121_v40 }
 0x1d9   : > { %1462 = vmatprep.mubr.f32.mxu1 %v1083_v36 }
 0x1dc   : > { %1463 = vmatmul.mubr.f32.gmra.mrb[42].mxu1 %v1120_v6 }
 0x1dd   : > { %1467 = vmatprep.mubr.f32.mxu1 %v1084_v11 }
 0x1e0   : > { %1846 = vmatmul.mubr.msk.f32.gmra.mrb[44].mxu1 %vm3652_vm5, %v1119_v58 }
 0x1e1   : > { %1472 = vmatprep.mubr.f32.mxu1 %v1085_v15 }
 0x1e4   : > { %1473 = vmatmul.mubr.f32.gmra.mrb[46].mxu1 %v1118_v13 }
 0x247   : > { %v2177_v1 = vpop.f32.mrb[32].mxu0 }
 0x248   : > { %v1544_v33 = vpop.f32.mrb[33].mxu0 }
 0x24f   : > { %v2180_v18 = vpop.f32.mrb[34].mxu0 }
 0x250   : > { %v1554_v46 = vpop.f32.mrb[35].mxu0 }
 0x257   : > { %v3429_v63 = vpop.f32.mrb[36].mxu0 }
 0x258   : > { %v1564_v49 = vpop.f32.mrb[37].mxu0 }
 0x25f   : > { %v3431_v20 = vpop.f32.mrb[38].mxu0 }
 0x260   : > { %v3433_v62 = vpop.f32.mrb[39].mxu0 }
 0x267   : > { %v3435_v50 = vpop.f32.mrb[40].mxu0 }
 0x268   : > { %v3437_v59 = vpop.f32.mrb[41].mxu0 }
 0x26f   : > { %v3439_v38 = vpop.f32.mrb[42].mxu0 }
 0x270   : > { %v3441_v9 = vpop.f32.mrb[43].mxu0 }
 0x277   : > { %v3443_v43 = vpop.f32.mrb[44].mxu0 }
 0x278   : > { %v3445_v32 = vpop.f32.mrb[45].mxu0 }
 0x27b   : > { %v2007_v55 = vpop.f32.mrb[16].mxu1 }
 0x27c   : > { %v2008_v0 = vpop.f32.mrb[17].mxu1  ;;  %v3452_v3 = vpop.f32.mrb[46].mxu0 }
 0x27d   : > { %v2009_v57 = vadd.f32 %v2008_v0, %v2007_v55  ;;  %v3454_v5 = vpop.f32.mrb[47].mxu0  ;;  %v2419_v55 = vld [vmem:[%s2813_s12 + $0x28] sm:$0xff] }
 0x27f   : > { %v1400_v2 = vadd.f32 %v2009_v57, %v3450_v10  ;;  %v2010_v34 = vpop.f32.mrb[18].mxu1 }
 0x280   : > { %v2011_v24 = vpop.f32.mrb[19].mxu1 }
 0x281   : > { %v1545_v27 = vadd.f32 %v1544_v33, %v1400_v2  ;;  %v2012_v23 = vadd.f32 %v2011_v24, %v2010_v34 }
 0x283   : > { %v1623_v14 = vmax.f32 %v1545_v27, 0.0  ;;  %v1405_v53 = vadd.f32 %v2012_v23, %v3450_v10  ;;  %v2013_v48 = vpop.f32.mrb[20].mxu1  ;;  %v2420_v23 = vld [vmem:[%s2813_s12 + $0x30] sm:$0xff] }
 0x284   : > { %v2014_v30 = vpop.f32.mrb[21].mxu1 }
 0x285   : > { %v1639_v44 = vadd.f32 %v2414_v39, %v1623_v14  ;;  %v1550_v31 = vadd.f32 %v2177_v1, %v1405_v53  ;;  %v2015_v16 = vadd.f32 %v2014_v30, %v2013_v48 }
 0x287   : > { %1655 = vst [vmem:[%s3461_s10] sm:$0xff] %v1639_v44  ;;  %v1624_v7 = vmax.f32 %v1550_v31, 0.0  ;;  %v1410_v41 = vadd.f32 %v2015_v16, %v3450_v10  ;;  %v2016_v54 = vpop.f32.mrb[22].mxu1  ;;  %v2421_v31 = vld [vmem:[%s2813_s12 + $0x38] sm:$0xff] }
 0x288   : > { %v2017_v28 = vpop.f32.mrb[23].mxu1 }
 0x289   : > { %v1640_v36 = vadd.f32 %v2415_v52, %v1624_v7  ;;  %v1555_v42 = vadd.f32 %v1554_v46, %v1410_v41  ;;  %v2018_v26 = vadd.f32 %v2017_v28, %v2016_v54 }
 0x28b   : > { %1656 = vst [vmem:[%s3461_s10 + $0x8] sm:$0xff] %v1640_v36  ;;  %v1625_v35 = vmax.f32 %v1555_v42, 0.0  ;;  %v1415_v40 = vadd.f32 %v2018_v26, %v3450_v10  ;;  %v2019_v21 = vpop.f32.mrb[24].mxu1  ;;  %v2422_v36 = vld [vmem:[%s2813_s12 + $0x40] sm:$0xff] }
 0x28c   : > { %v2020_v22 = vpop.f32.mrb[25].mxu1 }
 0x28d   : > { %v1641_v4 = vadd.f32 %v2416_v37, %v1625_v35  ;;  %v1560_v29 = vadd.f32 %v2180_v18, %v1415_v40  ;;  %v2021_v45 = vadd.f32 %v2020_v22, %v2019_v21  ;;  %v2423_v37 = vld [vmem:[%s2813_s12 + $0x48] sm:$0xff] }
 0x28f   : > { %1657 = vst [vmem:[%s3461_s10 + $0x10] sm:$0xff] %v1641_v4  ;;  %v1626_v11 = vmax.f32 %v1560_v29, 0.0  ;;  %v1420_v60 = vadd.f32 %v2021_v45, %v3450_v10  ;;  %v2022_v6 = vpop.f32.mrb[26].mxu1 }
 0x290   : > { %v2023_v19 = vpop.f32.mrb[27].mxu1 }
 0x291   : > { %v1642_v61 = vadd.f32 %v2417_v25, %v1626_v11  ;;  %v1565_v15 = vadd.f32 %v1564_v49, %v1420_v60  ;;  %v2024_v51 = vadd.f32 %v2023_v19, %v2022_v6  ;;  %v2424_v19 = vld [vmem:[%s2813_s12 + $0x50] sm:$0xff] }
 0x293   : > { %1658 = vst [vmem:[%s3461_s10 + $0x18] sm:$0xff] %v1642_v61  ;;  %v1627_v58 = vmax.f32 %v1565_v15, 0.0  ;;  %v1425_v56 = vadd.f32 %v2024_v51, %v3450_v10  ;;  %v2025_v8 = vpop.f32.mrb[28].mxu1 }
 0x294   : > { %v2026_v17 = vpop.f32.mrb[29].mxu1 }
 0x295   : > { %v1643_v12 = vadd.f32 %v2418_v47, %v1627_v58  ;;  %v1570_v13 = vadd.f32 %v3429_v63, %v1425_v56  ;;  %v2027_v1 = vadd.f32 %v2026_v17, %v2025_v8  ;;  %v2425_v8 = vld [vmem:[%s2813_s12 + $0x58] sm:$0xff] }
 0x297   : > { %1659 = vst [vmem:[%s3461_s10 + $0x20] sm:$0xff] %v1643_v12  ;;  %v1628_v33 = vmax.f32 %v1570_v13, 0.0  ;;  %v1430_v18 = vadd.f32 %v2027_v1, %v3450_v10  ;;  %v2028_v46 = vpop.f32.mrb[30].mxu1 }
 0x298   : > { %v2029_v49 = vpop.f32.mrb[31].mxu1 }
 0x299   : > { %v1644_v0 = vadd.f32 %v2419_v55, %v1628_v33  ;;  %v1575_v57 = vadd.f32 %v3433_v62, %v1430_v18  ;;  %v2030_v2 = vadd.f32 %v2029_v49, %v2028_v46  ;;  %v2426_v18 = vld [vmem:[%s2813_s12 + $0x60] sm:$0xff] }
 0x29b   : > { %1660 = vst [vmem:[%s3461_s10 + $0x28] sm:$0xff] %v1644_v0  ;;  %v1629_v34 = vmax.f32 %v1575_v57, 0.0  ;;  %v1435_v24 = vadd.f32 %v2030_v2, %v3450_v10  ;;  %v2031_v63 = vpop.f32.mrb[32].mxu1 }
 0x29c   : > { %v2032_v27 = vpop.f32.mrb[33].mxu1 }
 0x29d   : > { %v1645_v14 = vadd.f32 %v2420_v23, %v1629_v34  ;;  %v1580_v53 = vadd.f32 %v3431_v20, %v1435_v24  ;;  %v2033_v48 = vadd.f32 %v2032_v27, %v2031_v63  ;;  %v2427_v34 = vld [vmem:[%s2813_s12 + $0x68] sm:$0xff] }
 0x29f   : > { %1661 = vst [vmem:[%s3461_s10 + $0x30] sm:$0xff] %v1645_v14  ;;  %v1630_v30 = vmax.f32 %v1580_v53, 0.0  ;;  %v1440_v39 = vadd.f32 %v2033_v48, %v3450_v10  ;;  %v2034_v62 = vpop.f32.mrb[34].mxu1  ;;  %v2428_v14 = vld [vmem:[%s2813_s12 + $0x70] sm:$0xff] }
 0x2a0   : > { %v2035_v44 = vpop.f32.mrb[35].mxu1 }
 0x2a1   : > { %v1646_v16 = vadd.f32 %v2421_v31, %v1630_v30  ;;  %v1585_v7 = vadd.f32 %v3437_v59, %v1440_v39  ;;  %v2036_v41 = vadd.f32 %v2035_v44, %v2034_v62 }
 0x2a3   : > { %1662 = vst [vmem:[%s3461_s10 + $0x38] sm:$0xff] %v1646_v16  ;;  %v1631_v54 = vmax.f32 %v1585_v7, 0.0  ;;  %v1445_v28 = vadd.f32 %v2036_v41, %v3450_v10  ;;  %v2037_v20 = vpop.f32.mrb[36].mxu1 }
 0x2a4   : > { %v2038_v52 = vpop.f32.mrb[37].mxu1 }
 0x2a5   : > { %v1647_v42 = vadd.f32 %v2422_v36, %v1631_v54  ;;  %v1590_v26 = vadd.f32 %v3435_v50, %v1445_v28  ;;  %v2039_v35 = vadd.f32 %v2038_v52, %v2037_v20 }
 0x2a7   : > { %1663 = vst [vmem:[%s3461_s10 + $0x40] sm:$0xff] %v1647_v42  ;;  %v1632_v40 = vmax.f32 %v1590_v26, 0.0  ;;  %v1450_v21 = vadd.f32 %v2039_v35, %v3450_v10  ;;  %v2040_v59 = vpop.f32.mrb[38].mxu1 }
 0x2a8   : > { %v2041_v22 = vpop.f32.mrb[39].mxu1 }
 0x2a9   : > { %v1648_v4 = vadd.f32 %v2423_v37, %v1632_v40  ;;  %v1595_v29 = vadd.f32 %v3441_v9, %v1450_v21  ;;  %v2042_v45 = vadd.f32 %v2041_v22, %v2040_v59 }
 0x2ab   : > { %1664 = vst [vmem:[%s3461_s10 + $0x48] sm:$0xff] %v1648_v4  ;;  %v1633_v11 = vmax.f32 %v1595_v29, 0.0  ;;  %v1455_v60 = vadd.f32 %v2042_v45, %v3450_v10  ;;  %v2043_v50 = vpop.f32.mrb[40].mxu1 }
 0x2ac   : > { %v2044_v6 = vpop.f32.mrb[41].mxu1 }
 0x2ad   : > { %v1649_v25 = vadd.f32 %v2424_v19, %v1633_v11  ;;  %v1600_v61 = vadd.f32 %v3439_v38, %v1455_v60  ;;  %v2045_v15 = vadd.f32 %v2044_v6, %v2043_v50 }
 0x2af   : > { %1665 = vst [vmem:[%s3461_s10 + $0x50] sm:$0xff] %v1649_v25  ;;  %v1634_v51 = vmax.f32 %v1600_v61, 0.0  ;;  %v1460_v58 = vadd.f32 %v2045_v15, %v3450_v10  ;;  %v2046_v9 = vpop.f32.mrb[42].mxu1 }
 0x2b0   : > { %v2047_v56 = vpop.f32.mrb[43].mxu1 }
 0x2b1   : > { %v1650_v17 = vadd.f32 %v2425_v8, %v1634_v51  ;;  %v1605_v47 = vadd.f32 %v3445_v32, %v1460_v58  ;;  %v2048_v12 = vadd.f32 %v2047_v56, %v2046_v9 }
 0x2b3   : > { %1666 = vst [vmem:[%s3461_s10 + $0x58] sm:$0xff] %v1650_v17  ;;  %v1635_v13 = vmax.f32 %v1605_v47, 0.0  ;;  %v1465_v1 = vadd.f32 %v2048_v12, %v3450_v10  ;;  %v2049_v38 = vpop.f32.mrb[44].mxu1 }
 0x2b4   : > { %v2050_v33 = vpop.f32.mrb[45].mxu1 }
 0x2b5   : > { %v1651_v46 = vadd.f32 %v2426_v18, %v1635_v13  ;;  %v1610_v49 = vadd.f32 %v3443_v43, %v1465_v1  ;;  %v2051_v55 = vadd.f32 %v2050_v33, %v2049_v38 }
 0x2b7   : > { %1667 = vst [vmem:[%s3461_s10 + $0x60] sm:$0xff] %v1651_v46  ;;  %v1636_v0 = vmax.f32 %v1610_v49, 0.0  ;;  %v1470_v32 = vadd.f32 %v2051_v55, %v3450_v10  ;;  %v2052_v57 = vpop.f32.mrb[46].mxu1 }
 0x2b8   : > { %v2053_v2 = vpop.f32.mrb[47].mxu1 }
 0x2b9   : > { %v1652_v24 = vadd.f32 %v2427_v34, %v1636_v0  ;;  %v1615_v63 = vadd.f32 %v3454_v5, %v1470_v32  ;;  %v2054_v27 = vadd.f32 %v2053_v2, %v2052_v57 }
 0x2bb   : > { %1668 = vst [vmem:[%s3461_s10 + $0x68] sm:$0xff] %v1652_v24  ;;  %v1637_v43 = vmax.f32 %v1615_v63, 0.0  ;;  %v1475_v23 = vadd.f32 %v2054_v27, %v3450_v10  ;;  %v2429_v10 = vld [vmem:[%s2813_s12 + $0x78] sm:$0xff] }
 0x2bd   : > { %v1653_v53 = vadd.f32 %v2428_v14, %v1637_v43  ;;  %v1620_v48 = vadd.f32 %v3452_v3, %v1475_v23 }
 0x2bf   : > { %1669 = vst [vmem:[%s3461_s10 + $0x70] sm:$0xff] %v1653_v53  ;;  %v1638_v30 = vmax.f32 %v1620_v48, 0.0 }
 0x2c1   : > { %v1654_v5 = vadd.f32 %v2429_v10, %v1638_v30 }
 0x2c3   : > { %1670 = vst [vmem:[%s3461_s10 + $0x78] sm:$0xff] %v1654_v5 }
 0x2c4   : > { %2529 = shalt.err (!%p2526_p1)
}
 0x2c5   : > { %s2530_s12 = scalar_lea.hbm %s3522_s11, 2048  ;;  %s2534_s15 = scalar_lea.hbm %s3575_s5, 4096 }
 0x2c6   : > { %p2531_p13 = scmp.ne.s32.totalorder %s3522_s11, %s2530_s12  ;;  %p2535_p4 = scmp.lt.u32.totalorder %s3522_s11, %s3575_s5 }
 0x2c7   : > { %p2536_p5 = scmp.lt.u32.totalorder %s2534_s15, %s2530_s12  ;;  %p2538_p11 = scmp.lt.u32.totalorder %s2530_s12, %s3522_s11 }
 0x2c8   : > { %p2532_p6 = pnand %p2531_p13, %p3653_p0 }
 0x2c9   : > { %p2537_p8 = por %p2536_p5, %p2535_p4 }
 0x2ca   : > { %p2533_p10 = pneg %p2532_p6 }
 0x2cb   : > { %p2539_p2 = por %p2538_p11, %p2537_p8 }
 0x2cd   : > { %p2540_p3 = pnand %p2539_p2, %p2533_p10 }
 0x2cf   : > { %2543 = shalt.err (!%p2540_p3)
}
 0x2d0   : > { %s2594_s28 = smov 128   ;;  %s2595_s9 = smov 8  }
 0x2d1   : > { %2337 = dma.vmem_to_hbm [thread:$0]  (%p3653_p0), %s3524_s13, 2048, %s3522_s11, %s1672_s17, %s2594_s28, %s2594_s28, %s2595_s9  }
 0x2d2 PF: > { %s1700_s30 = sand.u32 1, %s2574_s18   ;;  %p3654_p7 = scmp.ne.s32.totalorder %s3584_s25, 0 }
 0x2d3   : > { %p3655_p9 = scmp.ge.s32.totalorder %s2586_s21, 2  ;;  %s1701_s7 = scalar_lea.sflag [#allocation5], %s1700_s30 }
 0x2d5   : > { %p2351_p12 = pnand %p3655_p9, %p3654_p7 }
 0x2d7   : > { %2569 = dma.done.wait (!%p2351_p12), %s1701_s7, 2048  }
 0x2d8   : > { %2571 = vsyncadd (!%p2351_p12), %s1701_s7, 4294965248  ;;  %p19_p1 = scmp.ge.s32.totalorder %s2742_s29, 4   ;;  %s3656_s18 = smov %s2578_s19 }
 0x2d9   : > { %s3657_s19 = smov %s2582_s20  ;;  %s3658_s20 = smov %s2758_s27 }
 0x2da   : > { %s3659_s21 = smov %s2742_s29  ;;  %21 = sbr.rel (!%p19_p1) target bundleno = 6 (0x6), region = 93 }
 0x2e1   :  { %1706 = vsyncpa [#allocation4], 1 }
 0x2e2   :  { %1708 = vsyncpa [#allocation4 + $0x1], 1 }
 0x2e3   :  { %1709 = vsyncpa [#allocation7], 1 }
 0x2e4   :  { %1710 = vsyncpa [#allocation5], 1 }
 0x2e5   :  { %1712 = vsyncpa [#allocation5 + $0x1], 1 }

</bundles_post_ra>
